<compile_context>
chip_gen: v6e
topology: v6e:2x2x1
jax: 0.10.0
libtpu: 0.0.40
codegen_flags: <defaults>
</compile_context>

<pallas_src>
import functools

import numpy as np
import jax
import jax.numpy as jnp
from jax.experimental import pallas as pl
from jax.experimental.pallas import tpu as pltpu

POOL_SIZES = (1, 2, 3, 6)
SUBLANE = 8
LANE = 128
THW_MAX = 1024                       # max HW rows per grid step
X_BLOCK_BYTES_TARGET = 2 * 1024 * 1024   # ~2 MiB bf16 x-block per step


def _round_up(a, b):
    return (a + b - 1) // b * b


# ----------------------------------------------------------------------------
# Host-side linear operators for adaptive avg-pool and bilinear upsample.
# ----------------------------------------------------------------------------
def adaptive_pool_matrix(out_size, in_size):
    """Row-stochastic matrix M (out, in) s.t. M @ v == AdaptiveAvgPool1d(v)."""
    m = np.zeros((out_size, in_size), dtype=np.float32)
    for i in range(out_size):
        start = (i * in_size) // out_size
        end = -((-(i + 1) * in_size) // out_size)       # ceil((i+1)*in/out)
        m[i, start:end] = 1.0 / float(end - start)
    return m


def bilinear_up_matrix(out_size, in_size):
    """Matrix M (out, in) implementing bilinear resize with align_corners=True."""
    m = np.zeros((out_size, in_size), dtype=np.float32)
    if in_size == 1:
        m[:, 0] = 1.0
        return m
    if out_size == 1:
        m[0, 0] = 1.0
        return m
    scale = (in_size - 1) / (out_size - 1)
    for i in range(out_size):
        src = i * scale
        j0 = int(np.floor(src))
        j1 = min(j0 + 1, in_size - 1)
        frac = src - j0
        m[i, j0] += 1.0 - frac
        m[i, j1] += frac
    return m


def build_stacked_operators(H, W):
    """Stacked pooling / upsample operators with 8-aligned per-branch row blocks.

    Returns P_all (SP, HW), U_all (HW, SP), row_blocks [(start, rows_padded)].
    Padding rows/cols are zero, so the math is unchanged.
    """
    HW = H * W
    P_parts, U_parts, row_blocks = [], [], []
    start = 0
    for s in POOL_SIZES:
        Ph, Pw = adaptive_pool_matrix(s, H), adaptive_pool_matrix(s, W)
        Uh, Uw = bilinear_up_matrix(H, s), bilinear_up_matrix(W, s)
        P_s = np.kron(Ph, Pw)                       # (s*s, HW)
        U_s = np.kron(Uh, Uw)                       # (HW, s*s)
        rows = s * s
        rows_pad = _round_up(rows, SUBLANE)
        P_pad = np.zeros((rows_pad, HW), np.float32)
        P_pad[:rows] = P_s
        U_pad = np.zeros((HW, rows_pad), np.float32)
        U_pad[:, :rows] = U_s
        P_parts.append(P_pad)
        U_parts.append(U_pad)
        row_blocks.append((start, rows_pad))
        start += rows_pad
    return (np.concatenate(P_parts, axis=0),
            np.concatenate(U_parts, axis=1),
            tuple(row_blocks))


# ----------------------------------------------------------------------------
# Deterministic parameter init (mirrors the PyTorch module's shapes).
# ----------------------------------------------------------------------------
def init_params(key, C):
    ks = jax.random.split(key, len(POOL_SIZES) + 1)
    stage_w = [
        jax.random.normal(ks[i], (C, C), jnp.float32) / np.sqrt(C)
        for i in range(len(POOL_SIZES))
    ]
    wf = jax.random.normal(ks[-1], (C, (len(POOL_SIZES) + 1) * C), jnp.float32) / np.sqrt(
        (len(POOL_SIZES) + 1) * C
    )
    bn = dict(
        gamma=jnp.ones((C,), jnp.float32),
        beta=jnp.zeros((C,), jnp.float32),
        mean=jnp.zeros((C,), jnp.float32),
        var=jnp.ones((C,), jnp.float32),
        eps=1e-5,
    )
    return dict(stage_w=stage_w, wf=wf, bn=bn)


# ----------------------------------------------------------------------------
# Pass A: pooling over HW tiles + folded per-branch 1x1 convs on pooled rows.
# ----------------------------------------------------------------------------
def pooling_stage_kernel(x_ref,                     # (Bt, Thw, Cp)  bf16
                         p_ref,                     # (SPp, Thw)     bf16
                         wc0_ref, wc1_ref, wc2_ref, wc3_ref,   # (Cp, Cp) bf16
                         t_ref,                     # (Bt, SPp, Cp)  f32 (out)
                         pooled_acc,                # (Bt, SPp, Cp)  f32 scratch
                         *, row_blocks):
    h = pl.program_id(1)
    bt = x_ref.shape[0]

    @pl.when(h == 0)
    def _init():
        pooled_acc[...] = jnp.zeros_like(pooled_acc)

    p = p_ref[...]
    for b in range(bt):                             # pooling: short loop over Bt
        pooled_acc[b] = pooled_acc[b] + jnp.dot(
            p, x_ref[b], preferred_element_type=jnp.float32)

    @pl.when(h == pl.num_programs(1) - 1)
    def _finalize():
        wc_refs = (wc0_ref, wc1_ref, wc2_ref, wc3_ref)
        t_ref[...] = jnp.zeros_like(t_ref)          # zero pad rows (72..SPp-1)
        for b in range(bt):
            pooled_b = pooled_acc[b].astype(jnp.bfloat16)       # (SPp, Cp)
            for (start, rows), wc_ref in zip(row_blocks, wc_refs):
                t_ref[b, start:start + rows, :] = jnp.dot(
                    pooled_b[start:start + rows], wc_ref[...],
                    preferred_element_type=jnp.float32)


# ----------------------------------------------------------------------------
# Pass B: identity branch + stacked bilinear upsample + folded BN + ReLU.
# ----------------------------------------------------------------------------
def fuse_upsample_kernel(x_ref,                     # (Bt, Thw, Cp)  bf16
                         u_ref,                     # (Thw, SPp)     bf16
                         t_ref,                     # (Bt, SPp, Cp)  f32
                         w_id_ref,                  # (Cp, Cp)       bf16
                         scale_ref, shift_ref,      # (1, Cp)        f32
                         o_ref):                    # (Bt, Thw, Cp)  bf16 (out)
    bt, thw, cp = x_ref.shape
    u = u_ref[...]
    scale = scale_ref[...]
    shift = shift_ref[...]

    # Identity branch: one MXU pass over the whole (Bt*Thw, Cp) slab.
    ident = jnp.dot(x_ref[...].reshape(bt * thw, cp), w_id_ref[...],
                    preferred_element_type=jnp.float32)

    for b in range(bt):
        acc = ident[b * thw:(b + 1) * thw, :]
        acc = acc + jnp.dot(u, t_ref[b].astype(jnp.bfloat16),
                            preferred_element_type=jnp.float32)
        y = acc * scale + shift                     # folded eval-mode BN
        o_ref[b] = jnp.maximum(y, 0.0).astype(o_ref.dtype)


# ----------------------------------------------------------------------------
# pallas_call plumbing.
# ----------------------------------------------------------------------------
def _vmem_limit_bytes(needed):
    try:
        cap = int(getattr(pltpu.get_tpu_info(), "vmem_capacity_bytes", 64 << 20))
    except Exception:
        cap = 64 << 20                              # v7x-safe fallback
    limit = max(int(needed * 1.25) + (2 << 20), 32 << 20)
    return min(limit, cap - (4 << 20))


def _ppm_pallas(x_pad, p_all, u_all, w_id, w_comb, scale, shift, *,
                row_blocks, bt, thw, cp, spp, nb, n_hw, single_buffer):
    cdt = x_pad.dtype
    n_pad, hw_pad = x_pad.shape[0], x_pad.shape[1]

    def inv_spec(shape):
        # Grid-invariant operand: constant index map; single-buffer if supported.
        idx = lambda b, h: (0,) * len(shape)
        if single_buffer:
            return pl.BlockSpec(shape, idx, pipeline_mode=pl.Buffered(1))
        return pl.BlockSpec(shape, idx)

    x_spec = pl.BlockSpec((bt, thw, cp), lambda b, h: (b, h, 0))
    wbuf = 1 if single_buffer else 2

    # ---------------- Pass A: pooling + folded branch convs ----------------
    bytes_a = (2 * bt * thw * cp * 2                # x block (double-buffered)
               + 2 * spp * thw * 2                  # P tile
               + wbuf * 4 * cp * cp * 2             # 4 folded branch weights
               + 2 * bt * spp * cp * 4              # t output block
               + bt * spp * cp * 4)                 # pooled accumulator scratch
    t_all = pl.pallas_call(
        functools.partial(pooling_stage_kernel, row_blocks=row_blocks),
        out_shape=jax.ShapeDtypeStruct((n_pad, spp, cp), jnp.float32),
        grid=(nb, n_hw),
        in_specs=[x_spec,
                  pl.BlockSpec((spp, thw), lambda b, h: (0, h)),
                  inv_spec((cp, cp)), inv_spec((cp, cp)),
                  inv_spec((cp, cp)), inv_spec((cp, cp))],
        out_specs=pl.BlockSpec((bt, spp, cp), lambda b, h: (b, 0, 0)),
        scratch_shapes=[pltpu.VMEM((bt, spp, cp), jnp.float32)],
        compiler_params=pltpu.CompilerParams(
            dimension_semantics=("parallel", "arbitrary"),
            vmem_limit_bytes=_vmem_limit_bytes(bytes_a)),
    )(x_pad, p_all, *w_comb)

    # -------- Pass B: identity + stacked upsample + BN + ReLU (bf16 out) ---
    bytes_b = (2 * bt * thw * cp * 2                # x block
               + 2 * thw * spp * 2                  # U tile
               + 2 * bt * spp * cp * 4              # t block
               + wbuf * (cp * cp * 2 + 2 * cp * 4)  # w_id + scale/shift
               + 2 * bt * thw * cp * 2)             # bf16 output block
    out = pl.pallas_call(
        fuse_upsample_kernel,
        out_shape=jax.ShapeDtypeStruct((n_pad, hw_pad, cp), cdt),
        grid=(nb, n_hw),
        in_specs=[x_spec,
                  pl.BlockSpec((thw, spp), lambda b, h: (h, 0)),
                  pl.BlockSpec((bt, spp, cp), lambda b, h: (b, 0, 0)),
                  inv_spec((cp, cp)),
                  inv_spec((1, cp)), inv_spec((1, cp))],
        out_specs=pl.BlockSpec((bt, thw, cp), lambda b, h: (b, h, 0)),
        compiler_params=pltpu.CompilerParams(
            dimension_semantics=("parallel", "parallel"),
            vmem_limit_bytes=_vmem_limit_bytes(bytes_b)),
    )(x_pad, u_all, t_all, w_id, scale, shift)

    return jax.block_until_ready(out)


def pyramid_pooling_forward(x_nchw, params):
    N, C, H, W = x_nchw.shape
    HW = H * W
    cdt = jnp.bfloat16
    n_branch = len(POOL_SIZES)

    # ---- tile-size / padding choices --------------------------------------
    Cp = _round_up(C, LANE)
    HW128 = _round_up(HW, LANE)
    Thw = min(HW128, THW_MAX)                       # multiple of 128
    HW_pad = _round_up(HW, Thw)
    n_hw = HW_pad // Thw
    x_block_bytes = Thw * Cp * 2
    Bt = max(1, min(N, X_BLOCK_BYTES_TARGET // max(x_block_bytes, 1)))
    N_pad = _round_up(N, Bt)
    nb = N_pad // Bt

    # ---- stacked pooling / upsample operators, SP padded to lane-dense 128 -
    P_raw, U_raw, row_blocks = build_stacked_operators(H, W)
    SP_raw = P_raw.shape[0]                         # 72 for pool sizes (1,2,3,6)
    SPp = _round_up(SP_raw, LANE)
    P_full = np.zeros((SPp, HW_pad), np.float32)
    P_full[:SP_raw, :HW] = P_raw
    U_full = np.zeros((HW_pad, SPp), np.float32)
    U_full[:HW, :SP_raw] = U_raw

    # ---- activations: NCHW f32 -> bf16 channel-last slab, padded -----------
    # (cast to bf16 before the transpose to halve wrapper-side HBM traffic)
    x_slab = jnp.transpose(x_nchw.astype(cdt), (0, 2, 3, 1)).reshape(N, HW, C)
    x_pad = jnp.pad(x_slab, ((0, N_pad - N), (0, HW_pad - HW), (0, Cp - C)))

    # ---- fold weights on the host ------------------------------------------
    wf = params["wf"]                               # (C, 5C)

    def pad_cc(w):                                  # (C, C) -> (Cp, Cp) bf16
        return jnp.pad(w, ((0, Cp - C), (0, Cp - C))).astype(cdt)

    w_id = pad_cc(wf[:, 0:C].T)                     # identity block of final conv
    w_comb = []
    for k in range(n_branch):
        wf_blk = wf[:, (k + 1) * C:(k + 2) * C]     # (C_out, C_in)
        w_comb.append(pad_cc(params["stage_w"][k].T @ wf_blk.T))

    bn = params["bn"]
    scale_c = bn["gamma"] / jnp.sqrt(bn["var"] + bn["eps"])
    shift_c = bn["beta"] - bn["mean"] * scale_c
    scale = jnp.pad(scale_c, (0, Cp - C)).reshape(1, Cp).astype(jnp.float32)
    shift = jnp.pad(shift_c, (0, Cp - C)).reshape(1, Cp).astype(jnp.float32)

    p_all = jnp.asarray(P_full).astype(cdt)
    u_all = jnp.asarray(U_full).astype(cdt)

    kwargs = dict(row_blocks=row_blocks, bt=Bt, thw=Thw, cp=Cp, spp=SPp,
                  nb=nb, n_hw=n_hw)
    try:
        out_pad = _ppm_pallas(x_pad, p_all, u_all, w_id, w_comb, scale, shift,
                              single_buffer=True, **kwargs)
    except Exception:
        # pl.Buffered(1) (single-buffered grid-invariant operands) unsupported on
        # this jax version -> fall back to default double buffering.
        out_pad = _ppm_pallas(x_pad, p_all, u_all, w_id, w_comb, scale, shift,
                              single_buffer=False, **kwargs)

    # drop padding, back to NCHW (still bf16 — the model's activation dtype)
    out = out_pad[:N, :HW, :C]
    return out.reshape(N, H, W, C).transpose(0, 3, 1, 2)


# ----------------------------------------------------------------------------
# Pure-JAX reference (same math as the PyTorch module, f32 HIGHEST precision).
# ----------------------------------------------------------------------------
def reference_forward(x_nchw, params):
    N, C, H, W = x_nchw.shape
    HW = H * W
    hp = jax.lax.Precision.HIGHEST

    x_flat = jnp.transpose(x_nchw, (0, 2, 3, 1)).reshape(N, HW, C)
    branches = [x_flat]
    for k, s in enumerate(POOL_SIZES):
        P_s = jnp.asarray(np.kron(adaptive_pool_matrix(s, H), adaptive_pool_matrix(s, W)))
        U_s = jnp.asarray(np.kron(bilinear_up_matrix(H, s), bilinear_up_matrix(W, s)))
        pooled = jnp.einsum("ph,nhc->npc", P_s, x_flat, precision=hp)
        conv = jnp.einsum("npc,dc->npd", pooled, params["stage_w"][k], precision=hp)
        up = jnp.einsum("hp,npd->nhd", U_s, conv, precision=hp)
        branches.append(up)
    cat = jnp.concatenate(branches, axis=-1)                          # (N, HW, 5C)
    out = jnp.einsum("nhc,dc->nhd", cat, params["wf"], precision=hp)  # (N, HW, C)

    bn = params["bn"]
    scale = bn["gamma"] / jnp.sqrt(bn["var"] + bn["eps"])
    shift = bn["beta"] - bn["mean"] * scale
    out = jnp.maximum(out * scale.reshape(1, 1, C) + shift.reshape(1, 1, C), 0.0)
    return out.reshape(N, H, W, C).transpose(0, 3, 1, 2)


if __name__ == "__main__":
    N, C, H, W = 2, 4, 16, 16
    key = jax.random.PRNGKey(0)
    k_x, k_w = jax.random.split(key)

    x = jax.random.normal(k_x, (N, C, H, W), dtype=jnp.float32)
    params = init_params(k_w, C)

    out = jax.block_until_ready(pyramid_pooling_forward(x, params))
    ref = reference_forward(x, params)

    assert out.shape == (N, C, H, W)
    # bf16 compute + bf16 output vs f32 HIGHEST reference -> loose tolerance.
    np.testing.assert_allclose(np.asarray(out).astype(np.float32),
                               np.asarray(ref), rtol=3e-2, atol=3e-2)

    print("KERNEL_OK")
</pallas_src>

<mosaic_0001>
module attributes {stable_mosaic.version = 11 : i64} {
  func.func @pooling_stage_kernel(%arg0: i32, %arg1: i32, %arg2: memref<2x256x128xbf16, #tpu.memory_space<vmem>>, %arg3: memref<128x256xbf16, #tpu.memory_space<vmem>>, %arg4: memref<128x128xbf16, #tpu.memory_space<vmem>>, %arg5: memref<128x128xbf16, #tpu.memory_space<vmem>>, %arg6: memref<128x128xbf16, #tpu.memory_space<vmem>>, %arg7: memref<128x128xbf16, #tpu.memory_space<vmem>>, %arg8: memref<2x128x128xf32, #tpu.memory_space<vmem>>, %arg9: memref<2x128x128xf32, #tpu.memory_space<vmem>>) attributes {dimension_semantics = [#tpu.dimension_semantics<parallel>, #tpu.dimension_semantics<arbitrary>], iteration_bounds = array<i64: 1, 1>, scalar_prefetch = 0 : i64, scratch_operands = 1 : i64, tpu.core_type = #tpu.core_type<tc>, window_params = [{transform_indices = @transform_0, window_bounds = array<i64: 2, 256, 128>}, {transform_indices = @transform_1, window_bounds = array<i64: 128, 256>}, {pipeline_mode = #tpu.pipeline_mode<synchronous>, transform_indices = @transform_2, window_bounds = array<i64: 128, 128>}, {pipeline_mode = #tpu.pipeline_mode<synchronous>, transform_indices = @transform_3, window_bounds = array<i64: 128, 128>}, {pipeline_mode = #tpu.pipeline_mode<synchronous>, transform_indices = @transform_4, window_bounds = array<i64: 128, 128>}, {pipeline_mode = #tpu.pipeline_mode<synchronous>, transform_indices = @transform_5, window_bounds = array<i64: 128, 128>}, {transform_indices = @transform_6, window_bounds = array<i64: 2, 128, 128>}]} {
    %c0_i32 = arith.constant 0 : i32
    %0 = arith.cmpi eq, %arg1, %c0_i32 : i32
    %1 = arith.extui %0 : i1 to i32
    %c0_i32_0 = arith.constant 0 : i32
    %2 = arith.cmpi ne, %1, %c0_i32_0 : i32
    scf.if %2 {
      %cst_22 = arith.constant 0.000000e+00 : f32
      %25 = vector.broadcast %cst_22 : f32 to vector<2x128x128xf32>
      %c0_23 = arith.constant 0 : index
      %c0_24 = arith.constant 0 : index
      %c0_25 = arith.constant 0 : index
      %26 = vector.load %arg9[%c0_23, %c0_24, %c0_25] : memref<2x128x128xf32, #tpu.memory_space<vmem>>, vector<2x128x128xf32>
      tpu.vector_store %arg9[%c0_23, %c0_24, %c0_25], %25 {strides = array<i32>} : memref<2x128x128xf32, #tpu.memory_space<vmem>>, vector<2x128x128xf32>,
    } else {
    }
    %c0 = arith.constant 0 : index
    %c0_1 = arith.constant 0 : index
    %3 = vector.load %arg3[%c0, %c0_1] : memref<128x256xbf16, #tpu.memory_space<vmem>>, vector<128x256xbf16>
    %c0_2 = arith.constant 0 : index
    %c0_3 = arith.constant 0 : index
    %c0_4 = arith.constant 0 : index
    %4 = vector.load %arg9[%c0_2, %c0_3, %c0_4] : memref<2x128x128xf32, #tpu.memory_space<vmem>>, vector<1x128x128xf32>
    %5 = vector.shape_cast %4 : vector<1x128x128xf32> to vector<128x128xf32>
    %c0_5 = arith.constant 0 : index
    %c0_6 = arith.constant 0 : index
    %c0_7 = arith.constant 0 : index
    %6 = vector.load %arg2[%c0_5, %c0_6, %c0_7] : memref<2x256x128xbf16, #tpu.memory_space<vmem>>, vector<1x256x128xbf16>
    %7 = vector.shape_cast %6 : vector<1x256x128xbf16> to vector<256x128xbf16>
    %cst = arith.constant dense<0.000000e+00> : vector<128x128xf32>
    %8 = tpu.matmul %3, %7, %cst {dimension_numbers = #tpu.dot_dimension_numbers<[1], [0], [0], [1], [0, 0, 1, 1], [], []>} : vector<128x256xbf16>, vector<256x128xbf16>, vector<128x128xf32> -> vector<128x128xf32>
    %9 = arith.addf %5, %8 : vector<128x128xf32>
    %c0_8 = arith.constant 0 : index
    %c0_9 = arith.constant 0 : index
    %c0_10 = arith.constant 0 : index
    %10 = vector.load %arg9[%c0_8, %c0_9, %c0_10] : memref<2x128x128xf32, #tpu.memory_space<vmem>>, vector<1x128x128xf32>
    %11 = vector.shape_cast %10 : vector<1x128x128xf32> to vector<128x128xf32>
    %12 = vector.shape_cast %9 : vector<128x128xf32> to vector<1x128x128xf32>
    tpu.vector_store %arg9[%c0_8, %c0_9, %c0_10], %12 {strides = array<i32>} : memref<2x128x128xf32, #tpu.memory_space<vmem>>, vector<1x128x128xf32>,
    %c1 = arith.constant 1 : index
    %c0_11 = arith.constant 0 : index
    %c0_12 = arith.constant 0 : index
    %13 = vector.load %arg9[%c1, %c0_11, %c0_12] : memref<2x128x128xf32, #tpu.memory_space<vmem>>, vector<1x128x128xf32>
    %14 = vector.shape_cast %13 : vector<1x128x128xf32> to vector<128x128xf32>
    %c1_13 = arith.constant 1 : index
    %c0_14 = arith.constant 0 : index
    %c0_15 = arith.constant 0 : index
    %15 = vector.load %arg2[%c1_13, %c0_14, %c0_15] : memref<2x256x128xbf16, #tpu.memory_space<vmem>>, vector<1x256x128xbf16>
    %16 = vector.shape_cast %15 : vector<1x256x128xbf16> to vector<256x128xbf16>
    %cst_16 = arith.constant dense<0.000000e+00> : vector<128x128xf32>
    %17 = tpu.matmul %3, %16, %cst_16 {dimension_numbers = #tpu.dot_dimension_numbers<[1], [0], [0], [1], [0, 0, 1, 1], [], []>} : vector<128x256xbf16>, vector<256x128xbf16>, vector<128x128xf32> -> vector<128x128xf32>
    %18 = arith.addf %14, %17 : vector<128x128xf32>
    %c1_17 = arith.constant 1 : index
    %c0_18 = arith.constant 0 : index
    %c0_19 = arith.constant 0 : index
    %19 = vector.load %arg9[%c1_17, %c0_18, %c0_19] : memref<2x128x128xf32, #tpu.memory_space<vmem>>, vector<1x128x128xf32>
    %20 = vector.shape_cast %19 : vector<1x128x128xf32> to vector<128x128xf32>
    %21 = vector.shape_cast %18 : vector<128x128xf32> to vector<1x128x128xf32>
    tpu.vector_store %arg9[%c1_17, %c0_18, %c0_19], %21 {strides = array<i32>} : memref<2x128x128xf32, #tpu.memory_space<vmem>>, vector<1x128x128xf32>,
    %c0_i32_20 = arith.constant 0 : i32
    %22 = arith.cmpi eq, %arg1, %c0_i32_20 : i32
    %23 = arith.extui %22 : i1 to i32
    %c0_i32_21 = arith.constant 0 : i32
    %24 = arith.cmpi ne, %23, %c0_i32_21 : i32
    scf.if %24 {
      %cst_22 = arith.constant 0.000000e+00 : f32
      %25 = vector.broadcast %cst_22 : f32 to vector<2x128x128xf32>
      %c0_23 = arith.constant 0 : index
      %c0_24 = arith.constant 0 : index
      %c0_25 = arith.constant 0 : index
      %26 = vector.load %arg8[%c0_23, %c0_24, %c0_25] : memref<2x128x128xf32, #tpu.memory_space<vmem>>, vector<2x128x128xf32>
      tpu.vector_store %arg8[%c0_23, %c0_24, %c0_25], %25 {strides = array<i32>} : memref<2x128x128xf32, #tpu.memory_space<vmem>>, vector<2x128x128xf32>,
      %c0_26 = arith.constant 0 : index
      %c0_27 = arith.constant 0 : index
      %c0_28 = arith.constant 0 : index
      %27 = vector.load %arg9[%c0_26, %c0_27, %c0_28] : memref<2x128x128xf32, #tpu.memory_space<vmem>>, vector<1x128x128xf32>
      %28 = vector.shape_cast %27 : vector<1x128x128xf32> to vector<128x128xf32>
      %29 = arith.truncf %28 : vector<128x128xf32> to vector<128x128xbf16>
      %30 = vector.extract_strided_slice %29 {offsets = [0, 0], sizes = [8, 128], strides = [1, 1]} : vector<128x128xbf16> to vector<8x128xbf16>
      %c0_29 = arith.constant 0 : index
      %c0_30 = arith.constant 0 : index
      %31 = vector.load %arg4[%c0_29, %c0_30] : memref<128x128xbf16, #tpu.memory_space<vmem>>, vector<128x128xbf16>
      %cst_31 = arith.constant dense<0.000000e+00> : vector<8x128xf32>
      %32 = tpu.matmul %30, %31, %cst_31 {dimension_numbers = #tpu.dot_dimension_numbers<[1], [0], [0], [1], [0, 0, 1, 1], [], []>} : vector<8x128xbf16>, vector<128x128xbf16>, vector<8x128xf32> -> vector<8x128xf32>
      %c0_32 = arith.constant 0 : index
      %c0_33 = arith.constant 0 : index
      %c0_34 = arith.constant 0 : index
      %33 = vector.load %arg8[%c0_32, %c0_33, %c0_34] : memref<2x128x128xf32, #tpu.memory_space<vmem>>, vector<1x8x128xf32>
      %34 = vector.shape_cast %33 : vector<1x8x128xf32> to vector<8x128xf32>
      %35 = vector.shape_cast %32 : vector<8x128xf32> to vector<1x8x128xf32>
      tpu.vector_store %arg8[%c0_32, %c0_33, %c0_34], %35 {strides = array<i32>} : memref<2x128x128xf32, #tpu.memory_space<vmem>>, vector<1x8x128xf32>,
      %36 = vector.extract_strided_slice %29 {offsets = [8, 0], sizes = [8, 128], strides = [1, 1]} : vector<128x128xbf16> to vector<8x128xbf16>
      %c0_35 = arith.constant 0 : index
      %c0_36 = arith.constant 0 : index
      %37 = vector.load %arg5[%c0_35, %c0_36] : memref<128x128xbf16, #tpu.memory_space<vmem>>, vector<128x128xbf16>
      %cst_37 = arith.constant dense<0.000000e+00> : vector<8x128xf32>
      %38 = tpu.matmul %36, %37, %cst_37 {dimension_numbers = #tpu.dot_dimension_numbers<[1], [0], [0], [1], [0, 0, 1, 1], [], []>} : vector<8x128xbf16>, vector<128x128xbf16>, vector<8x128xf32> -> vector<8x128xf32>
      %c0_38 = arith.constant 0 : index
      %c8 = arith.constant 8 : index
      %c0_39 = arith.constant 0 : index
      %39 = vector.load %arg8[%c0_38, %c8, %c0_39] : memref<2x128x128xf32, #tpu.memory_space<vmem>>, vector<1x8x128xf32>
      %40 = vector.shape_cast %39 : vector<1x8x128xf32> to vector<8x128xf32>
      %41 = vector.shape_cast %38 : vector<8x128xf32> to vector<1x8x128xf32>
      tpu.vector_store %arg8[%c0_38, %c8, %c0_39], %41 {strides = array<i32>} : memref<2x128x128xf32, #tpu.memory_space<vmem>>, vector<1x8x128xf32>,
      %42 = vector.extract_strided_slice %29 {offsets = [16, 0], sizes = [16, 128], strides = [1, 1]} : vector<128x128xbf16> to vector<16x128xbf16>
      %c0_40 = arith.constant 0 : index
      %c0_41 = arith.constant 0 : index
      %43 = vector.load %arg6[%c0_40, %c0_41] : memref<128x128xbf16, #tpu.memory_space<vmem>>, vector<128x128xbf16>
      %cst_42 = arith.constant dense<0.000000e+00> : vector<16x128xf32>
      %44 = tpu.matmul %42, %43, %cst_42 {dimension_numbers = #tpu.dot_dimension_numbers<[1], [0], [0], [1], [0, 0, 1, 1], [], []>} : vector<16x128xbf16>, vector<128x128xbf16>, vector<16x128xf32> -> vector<16x128xf32>
      %c0_43 = arith.constant 0 : index
      %c16 = arith.constant 16 : index
      %c0_44 = arith.constant 0 : index
      %45 = vector.load %arg8[%c0_43, %c16, %c0_44] : memref<2x128x128xf32, #tpu.memory_space<vmem>>, vector<1x16x128xf32>
      %46 = vector.shape_cast %45 : vector<1x16x128xf32> to vector<16x128xf32>
      %47 = vector.shape_cast %44 : vector<16x128xf32> to vector<1x16x128xf32>
      tpu.vector_store %arg8[%c0_43, %c16, %c0_44], %47 {strides = array<i32>} : memref<2x128x128xf32, #tpu.memory_space<vmem>>, vector<1x16x128xf32>,
      %48 = vector.extract_strided_slice %29 {offsets = [32, 0], sizes = [40, 128], strides = [1, 1]} : vector<128x128xbf16> to vector<40x128xbf16>
      %c0_45 = arith.constant 0 : index
      %c0_46 = arith.constant 0 : index
      %49 = vector.load %arg7[%c0_45, %c0_46] : memref<128x128xbf16, #tpu.memory_space<vmem>>, vector<128x128xbf16>
      %cst_47 = arith.constant dense<0.000000e+00> : vector<40x128xf32>
      %50 = tpu.matmul %48, %49, %cst_47 {dimension_numbers = #tpu.dot_dimension_numbers<[1], [0], [0], [1], [0, 0, 1, 1], [], []>} : vector<40x128xbf16>, vector<128x128xbf16>, vector<40x128xf32> -> vector<40x128xf32>
      %c0_48 = arith.constant 0 : index
      %c32 = arith.constant 32 : index
      %c0_49 = arith.constant 0 : index
      %51 = vector.load %arg8[%c0_48, %c32, %c0_49] : memref<2x128x128xf32, #tpu.memory_space<vmem>>, vector<1x40x128xf32>
      %52 = vector.shape_cast %51 : vector<1x40x128xf32> to vector<40x128xf32>
      %53 = vector.shape_cast %50 : vector<40x128xf32> to vector<1x40x128xf32>
      tpu.vector_store %arg8[%c0_48, %c32, %c0_49], %53 {strides = array<i32>} : memref<2x128x128xf32, #tpu.memory_space<vmem>>, vector<1x40x128xf32>,
      %c1_50 = arith.constant 1 : index
      %c0_51 = arith.constant 0 : index
      %c0_52 = arith.constant 0 : index
      %54 = vector.load %arg9[%c1_50, %c0_51, %c0_52] : memref<2x128x128xf32, #tpu.memory_space<vmem>>, vector<1x128x128xf32>
      %55 = vector.shape_cast %54 : vector<1x128x128xf32> to vector<128x128xf32>
      %56 = arith.truncf %55 : vector<128x128xf32> to vector<128x128xbf16>
      %57 = vector.extract_strided_slice %56 {offsets = [0, 0], sizes = [8, 128], strides = [1, 1]} : vector<128x128xbf16> to vector<8x128xbf16>
      %c0_53 = arith.constant 0 : index
      %c0_54 = arith.constant 0 : index
      %58 = vector.load %arg4[%c0_53, %c0_54] : memref<128x128xbf16, #tpu.memory_space<vmem>>, vector<128x128xbf16>
      %cst_55 = arith.constant dense<0.000000e+00> : vector<8x128xf32>
      %59 = tpu.matmul %57, %58, %cst_55 {dimension_numbers = #tpu.dot_dimension_numbers<[1], [0], [0], [1], [0, 0, 1, 1], [], []>} : vector<8x128xbf16>, vector<128x128xbf16>, vector<8x128xf32> -> vector<8x128xf32>
      %c1_56 = arith.constant 1 : index
      %c0_57 = arith.constant 0 : index
      %c0_58 = arith.constant 0 : index
      %60 = vector.load %arg8[%c1_56, %c0_57, %c0_58] : memref<2x128x128xf32, #tpu.memory_space<vmem>>, vector<1x8x128xf32>
      %61 = vector.shape_cast %60 : vector<1x8x128xf32> to vector<8x128xf32>
      %62 = vector.shape_cast %59 : vector<8x128xf32> to vector<1x8x128xf32>
      tpu.vector_store %arg8[%c1_56, %c0_57, %c0_58], %62 {strides = array<i32>} : memref<2x128x128xf32, #tpu.memory_space<vmem>>, vector<1x8x128xf32>,
      %63 = vector.extract_strided_slice %56 {offsets = [8, 0], sizes = [8, 128], strides = [1, 1]} : vector<128x128xbf16> to vector<8x128xbf16>
      %c0_59 = arith.constant 0 : index
      %c0_60 = arith.constant 0 : index
      %64 = vector.load %arg5[%c0_59, %c0_60] : memref<128x128xbf16, #tpu.memory_space<vmem>>, vector<128x128xbf16>
      %cst_61 = arith.constant dense<0.000000e+00> : vector<8x128xf32>
      %65 = tpu.matmul %63, %64, %cst_61 {dimension_numbers = #tpu.dot_dimension_numbers<[1], [0], [0], [1], [0, 0, 1, 1], [], []>} : vector<8x128xbf16>, vector<128x128xbf16>, vector<8x128xf32> -> vector<8x128xf32>
      %c1_62 = arith.constant 1 : index
      %c8_63 = arith.constant 8 : index
      %c0_64 = arith.constant 0 : index
      %66 = vector.load %arg8[%c1_62, %c8_63, %c0_64] : memref<2x128x128xf32, #tpu.memory_space<vmem>>, vector<1x8x128xf32>
      %67 = vector.shape_cast %66 : vector<1x8x128xf32> to vector<8x128xf32>
      %68 = vector.shape_cast %65 : vector<8x128xf32> to vector<1x8x128xf32>
      tpu.vector_store %arg8[%c1_62, %c8_63, %c0_64], %68 {strides = array<i32>} : memref<2x128x128xf32, #tpu.memory_space<vmem>>, vector<1x8x128xf32>,
      %69 = vector.extract_strided_slice %56 {offsets = [16, 0], sizes = [16, 128], strides = [1, 1]} : vector<128x128xbf16> to vector<16x128xbf16>
      %c0_65 = arith.constant 0 : index
      %c0_66 = arith.constant 0 : index
      %70 = vector.load %arg6[%c0_65, %c0_66] : memref<128x128xbf16, #tpu.memory_space<vmem>>, vector<128x128xbf16>
      %cst_67 = arith.constant dense<0.000000e+00> : vector<16x128xf32>
      %71 = tpu.matmul %69, %70, %cst_67 {dimension_numbers = #tpu.dot_dimension_numbers<[1], [0], [0], [1], [0, 0, 1, 1], [], []>} : vector<16x128xbf16>, vector<128x128xbf16>, vector<16x128xf32> -> vector<16x128xf32>
      %c1_68 = arith.constant 1 : index
      %c16_69 = arith.constant 16 : index
      %c0_70 = arith.constant 0 : index
      %72 = vector.load %arg8[%c1_68, %c16_69, %c0_70] : memref<2x128x128xf32, #tpu.memory_space<vmem>>, vector<1x16x128xf32>
      %73 = vector.shape_cast %72 : vector<1x16x128xf32> to vector<16x128xf32>
      %74 = vector.shape_cast %71 : vector<16x128xf32> to vector<1x16x128xf32>
      tpu.vector_store %arg8[%c1_68, %c16_69, %c0_70], %74 {strides = array<i32>} : memref<2x128x128xf32, #tpu.memory_space<vmem>>, vector<1x16x128xf32>,
      %75 = vector.extract_strided_slice %56 {offsets = [32, 0], sizes = [40, 128], strides = [1, 1]} : vector<128x128xbf16> to vector<40x128xbf16>
      %c0_71 = arith.constant 0 : index
      %c0_72 = arith.constant 0 : index
      %76 = vector.load %arg7[%c0_71, %c0_72] : memref<128x128xbf16, #tpu.memory_space<vmem>>, vector<128x128xbf16>
      %cst_73 = arith.constant dense<0.000000e+00> : vector<40x128xf32>
      %77 = tpu.matmul %75, %76, %cst_73 {dimension_numbers = #tpu.dot_dimension_numbers<[1], [0], [0], [1], [0, 0, 1, 1], [], []>} : vector<40x128xbf16>, vector<128x128xbf16>, vector<40x128xf32> -> vector<40x128xf32>
      %c1_74 = arith.constant 1 : index
      %c32_75 = arith.constant 32 : index
      %c0_76 = arith.constant 0 : index
      %78 = vector.load %arg8[%c1_74, %c32_75, %c0_76] : memref<2x128x128xf32, #tpu.memory_space<vmem>>, vector<1x40x128xf32>
      %79 = vector.shape_cast %78 : vector<1x40x128xf32> to vector<40x128xf32>
      %80 = vector.shape_cast %77 : vector<40x128xf32> to vector<1x40x128xf32>
      tpu.vector_store %arg8[%c1_74, %c32_75, %c0_76], %80 {strides = array<i32>} : memref<2x128x128xf32, #tpu.memory_space<vmem>>, vector<1x40x128xf32>,
    } else {
    }
    return
  }
  func.func @transform_0(%arg0: i32, %arg1: i32) -> (i32, i32, i32) {
    %c0_i32 = arith.constant 0 : i32
    %c0_i32_0 = arith.constant 0 : i32
    return %arg0, %arg1, %c0_i32 : i32, i32, i32
  }
  func.func @transform_1(%arg0: i32, %arg1: i32) -> (i32, i32) {
    %c0_i32 = arith.constant 0 : i32
    %c0_i32_0 = arith.constant 0 : i32
    return %c0_i32, %arg1 : i32, i32
  }
  func.func @transform_2(%arg0: i32, %arg1: i32) -> (i32, i32) {
    %c0_i32 = arith.constant 0 : i32
    %c0_i32_0 = arith.constant 0 : i32
    %c0_i32_1 = arith.constant 0 : i32
    return %c0_i32, %c0_i32_0 : i32, i32
  }
  func.func @transform_3(%arg0: i32, %arg1: i32) -> (i32, i32) {
    %c0_i32 = arith.constant 0 : i32
    %c0_i32_0 = arith.constant 0 : i32
    %c0_i32_1 = arith.constant 0 : i32
    return %c0_i32, %c0_i32_0 : i32, i32
  }
  func.func @transform_4(%arg0: i32, %arg1: i32) -> (i32, i32) {
    %c0_i32 = arith.constant 0 : i32
    %c0_i32_0 = arith.constant 0 : i32
    %c0_i32_1 = arith.constant 0 : i32
    return %c0_i32, %c0_i32_0 : i32, i32
  }
  func.func @transform_5(%arg0: i32, %arg1: i32) -> (i32, i32) {
    %c0_i32 = arith.constant 0 : i32
    %c0_i32_0 = arith.constant 0 : i32
    %c0_i32_1 = arith.constant 0 : i32
    return %c0_i32, %c0_i32_0 : i32, i32
  }
  func.func @transform_6(%arg0: i32, %arg1: i32) -> (i32, i32, i32) {
    %c0_i32 = arith.constant 0 : i32
    %c0_i32_0 = arith.constant 0 : i32
    %c0_i32_1 = arith.constant 0 : i32
    return %arg0, %c0_i32, %c0_i32_0 : i32, i32, i32
  }
}

module attributes {stable_mosaic.version = 11 : i64} {
  func.func @pooling_stage_kernel(%arg0: i32, %arg1: i32, %arg2: memref<2x256x128xbf16, #tpu.memory_space<vmem>>, %arg3: memref<128x256xbf16, #tpu.memory_space<vmem>>, %arg4: memref<128x128xbf16, #tpu.memory_space<vmem>>, %arg5: memref<128x128xbf16, #tpu.memory_space<vmem>>, %arg6: memref<128x128xbf16, #tpu.memory_space<vmem>>, %arg7: memref<128x128xbf16, #tpu.memory_space<vmem>>, %arg8: memref<2x128x128xf32, #tpu.memory_space<vmem>>, %arg9: memref<2x128x128xf32, #tpu.memory_space<vmem>>) attributes {dimension_semantics = [#tpu.dimension_semantics<parallel>, #tpu.dimension_semantics<arbitrary>], iteration_bounds = array<i64: 1, 1>, scalar_prefetch = 0 : i64, scratch_operands = 1 : i64, tpu.core_type = #tpu.core_type<tc>, window_params = [{transform_indices = @transform_0, window_bounds = array<i64: 2, 256, 128>}, {transform_indices = @transform_1, window_bounds = array<i64: 128, 256>}, {pipeline_mode = #tpu.pipeline_mode<synchronous>, transform_indices = @transform_2, window_bounds = array<i64: 128, 128>}, {pipeline_mode = #tpu.pipeline_mode<synchronous>, transform_indices = @transform_3, window_bounds = array<i64: 128, 128>}, {pipeline_mode = #tpu.pipeline_mode<synchronous>, transform_indices = @transform_4, window_bounds = array<i64: 128, 128>}, {pipeline_mode = #tpu.pipeline_mode<synchronous>, transform_indices = @transform_5, window_bounds = array<i64: 128, 128>}, {transform_indices = @transform_6, window_bounds = array<i64: 2, 128, 128>}]} {
    %c0_i32 = arith.constant 0 : i32
    %0 = arith.cmpi eq, %arg1, %c0_i32 : i32
    %1 = arith.extui %0 : i1 to i32
    %c0_i32_0 = arith.constant 0 : i32
    %2 = arith.cmpi ne, %1, %c0_i32_0 : i32
    scf.if %2 {
      %cst_22 = arith.constant 0.000000e+00 : f32
      %25 = vector.broadcast %cst_22 : f32 to vector<2x128x128xf32>
      %c0_23 = arith.constant 0 : index
      %c0_24 = arith.constant 0 : index
      %c0_25 = arith.constant 0 : index
      %26 = vector.load %arg9[%c0_23, %c0_24, %c0_25] : memref<2x128x128xf32, #tpu.memory_space<vmem>>, vector<2x128x128xf32>
      tpu.vector_store %arg9[%c0_23, %c0_24, %c0_25], %25 {strides = array<i32>} : memref<2x128x128xf32, #tpu.memory_space<vmem>>, vector<2x128x128xf32>,
    } else {
    }
    %c0 = arith.constant 0 : index
    %c0_1 = arith.constant 0 : index
    %3 = vector.load %arg3[%c0, %c0_1] : memref<128x256xbf16, #tpu.memory_space<vmem>>, vector<128x256xbf16>
    %c0_2 = arith.constant 0 : index
    %c0_3 = arith.constant 0 : index
    %c0_4 = arith.constant 0 : index
    %4 = vector.load %arg9[%c0_2, %c0_3, %c0_4] : memref<2x128x128xf32, #tpu.memory_space<vmem>>, vector<1x128x128xf32>
    %5 = vector.shape_cast %4 : vector<1x128x128xf32> to vector<128x128xf32>
    %c0_5 = arith.constant 0 : index
    %c0_6 = arith.constant 0 : index
    %c0_7 = arith.constant 0 : index
    %6 = vector.load %arg2[%c0_5, %c0_6, %c0_7] : memref<2x256x128xbf16, #tpu.memory_space<vmem>>, vector<1x256x128xbf16>
    %7 = vector.shape_cast %6 : vector<1x256x128xbf16> to vector<256x128xbf16>
    %cst = arith.constant dense<0.000000e+00> : vector<128x128xf32>
    %8 = tpu.matmul %3, %7, %cst {dimension_numbers = #tpu.dot_dimension_numbers<[1], [0], [0], [1], [0, 0, 1, 1], [], []>} : vector<128x256xbf16>, vector<256x128xbf16>, vector<128x128xf32> -> vector<128x128xf32>
    %9 = arith.addf %5, %8 : vector<128x128xf32>
    %c0_8 = arith.constant 0 : index
    %c0_9 = arith.constant 0 : index
    %c0_10 = arith.constant 0 : index
    %10 = vector.load %arg9[%c0_8, %c0_9, %c0_10] : memref<2x128x128xf32, #tpu.memory_space<vmem>>, vector<1x128x128xf32>
    %11 = vector.shape_cast %10 : vector<1x128x128xf32> to vector<128x128xf32>
    %12 = vector.shape_cast %9 : vector<128x128xf32> to vector<1x128x128xf32>
    tpu.vector_store %arg9[%c0_8, %c0_9, %c0_10], %12 {strides = array<i32>} : memref<2x128x128xf32, #tpu.memory_space<vmem>>, vector<1x128x128xf32>,
    %c1 = arith.constant 1 : index
    %c0_11 = arith.constant 0 : index
    %c0_12 = arith.constant 0 : index
    %13 = vector.load %arg9[%c1, %c0_11, %c0_12] : memref<2x128x128xf32, #tpu.memory_space<vmem>>, vector<1x128x128xf32>
    %14 = vector.shape_cast %13 : vector<1x128x128xf32> to vector<128x128xf32>
    %c1_13 = arith.constant 1 : index
    %c0_14 = arith.constant 0 : index
    %c0_15 = arith.constant 0 : index
    %15 = vector.load %arg2[%c1_13, %c0_14, %c0_15] : memref<2x256x128xbf16, #tpu.memory_space<vmem>>, vector<1x256x128xbf16>
    %16 = vector.shape_cast %15 : vector<1x256x128xbf16> to vector<256x128xbf16>
    %cst_16 = arith.constant dense<0.000000e+00> : vector<128x128xf32>
    %17 = tpu.matmul %3, %16, %cst_16 {dimension_numbers = #tpu.dot_dimension_numbers<[1], [0], [0], [1], [0, 0, 1, 1], [], []>} : vector<128x256xbf16>, vector<256x128xbf16>, vector<128x128xf32> -> vector<128x128xf32>
    %18 = arith.addf %14, %17 : vector<128x128xf32>
    %c1_17 = arith.constant 1 : index
    %c0_18 = arith.constant 0 : index
    %c0_19 = arith.constant 0 : index
    %19 = vector.load %arg9[%c1_17, %c0_18, %c0_19] : memref<2x128x128xf32, #tpu.memory_space<vmem>>, vector<1x128x128xf32>
    %20 = vector.shape_cast %19 : vector<1x128x128xf32> to vector<128x128xf32>
    %21 = vector.shape_cast %18 : vector<128x128xf32> to vector<1x128x128xf32>
    tpu.vector_store %arg9[%c1_17, %c0_18, %c0_19], %21 {strides = array<i32>} : memref<2x128x128xf32, #tpu.memory_space<vmem>>, vector<1x128x128xf32>,
    %c0_i32_20 = arith.constant 0 : i32
    %22 = arith.cmpi eq, %arg1, %c0_i32_20 : i32
    %23 = arith.extui %22 : i1 to i32
    %c0_i32_21 = arith.constant 0 : i32
    %24 = arith.cmpi ne, %23, %c0_i32_21 : i32
    scf.if %24 {
      %cst_22 = arith.constant 0.000000e+00 : f32
      %25 = vector.broadcast %cst_22 : f32 to vector<2x128x128xf32>
      %c0_23 = arith.constant 0 : index
      %c0_24 = arith.constant 0 : index
      %c0_25 = arith.constant 0 : index
      %26 = vector.load %arg8[%c0_23, %c0_24, %c0_25] : memref<2x128x128xf32, #tpu.memory_space<vmem>>, vector<2x128x128xf32>
      tpu.vector_store %arg8[%c0_23, %c0_24, %c0_25], %25 {strides = array<i32>} : memref<2x128x128xf32, #tpu.memory_space<vmem>>, vector<2x128x128xf32>,
      %c0_26 = arith.constant 0 : index
      %c0_27 = arith.constant 0 : index
      %c0_28 = arith.constant 0 : index
      %27 = vector.load %arg9[%c0_26, %c0_27, %c0_28] : memref<2x128x128xf32, #tpu.memory_space<vmem>>, vector<1x128x128xf32>
      %28 = vector.shape_cast %27 : vector<1x128x128xf32> to vector<128x128xf32>
      %29 = arith.truncf %28 : vector<128x128xf32> to vector<128x128xbf16>
      %30 = vector.extract_strided_slice %29 {offsets = [0, 0], sizes = [8, 128], strides = [1, 1]} : vector<128x128xbf16> to vector<8x128xbf16>
      %c0_29 = arith.constant 0 : index
      %c0_30 = arith.constant 0 : index
      %31 = vector.load %arg4[%c0_29, %c0_30] : memref<128x128xbf16, #tpu.memory_space<vmem>>, vector<128x128xbf16>
      %cst_31 = arith.constant dense<0.000000e+00> : vector<8x128xf32>
      %32 = tpu.matmul %30, %31, %cst_31 {dimension_numbers = #tpu.dot_dimension_numbers<[1], [0], [0], [1], [0, 0, 1, 1], [], []>} : vector<8x128xbf16>, vector<128x128xbf16>, vector<8x128xf32> -> vector<8x128xf32>
      %c0_32 = arith.constant 0 : index
      %c0_33 = arith.constant 0 : index
      %c0_34 = arith.constant 0 : index
      %33 = vector.load %arg8[%c0_32, %c0_33, %c0_34] : memref<2x128x128xf32, #tpu.memory_space<vmem>>, vector<1x8x128xf32>
      %34 = vector.shape_cast %33 : vector<1x8x128xf32> to vector<8x128xf32>
      %35 = vector.shape_cast %32 : vector<8x128xf32> to vector<1x8x128xf32>
      tpu.vector_store %arg8[%c0_32, %c0_33, %c0_34], %35 {strides = array<i32>} : memref<2x128x128xf32, #tpu.memory_space<vmem>>, vector<1x8x128xf32>,
      %36 = vector.extract_strided_slice %29 {offsets = [8, 0], sizes = [8, 128], strides = [1, 1]} : vector<128x128xbf16> to vector<8x128xbf16>
      %c0_35 = arith.constant 0 : index
      %c0_36 = arith.constant 0 : index
      %37 = vector.load %arg5[%c0_35, %c0_36] : memref<128x128xbf16, #tpu.memory_space<vmem>>, vector<128x128xbf16>
      %cst_37 = arith.constant dense<0.000000e+00> : vector<8x128xf32>
      %38 = tpu.matmul %36, %37, %cst_37 {dimension_numbers = #tpu.dot_dimension_numbers<[1], [0], [0], [1], [0, 0, 1, 1], [], []>} : vector<8x128xbf16>, vector<128x128xbf16>, vector<8x128xf32> -> vector<8x128xf32>
      %c0_38 = arith.constant 0 : index
      %c8 = arith.constant 8 : index
      %c0_39 = arith.constant 0 : index
      %39 = vector.load %arg8[%c0_38, %c8, %c0_39] : memref<2x128x128xf32, #tpu.memory_space<vmem>>, vector<1x8x128xf32>
      %40 = vector.shape_cast %39 : vector<1x8x128xf32> to vector<8x128xf32>
      %41 = vector.shape_cast %38 : vector<8x128xf32> to vector<1x8x128xf32>
      tpu.vector_store %arg8[%c0_38, %c8, %c0_39], %41 {strides = array<i32>} : memref<2x128x128xf32, #tpu.memory_space<vmem>>, vector<1x8x128xf32>,
      %42 = vector.extract_strided_slice %29 {offsets = [16, 0], sizes = [16, 128], strides = [1, 1]} : vector<128x128xbf16> to vector<16x128xbf16>
      %c0_40 = arith.constant 0 : index
      %c0_41 = arith.constant 0 : index
      %43 = vector.load %arg6[%c0_40, %c0_41] : memref<128x128xbf16, #tpu.memory_space<vmem>>, vector<128x128xbf16>
      %cst_42 = arith.constant dense<0.000000e+00> : vector<16x128xf32>
      %44 = tpu.matmul %42, %43, %cst_42 {dimension_numbers = #tpu.dot_dimension_numbers<[1], [0], [0], [1], [0, 0, 1, 1], [], []>} : vector<16x128xbf16>, vector<128x128xbf16>, vector<16x128xf32> -> vector<16x128xf32>
      %c0_43 = arith.constant 0 : index
      %c16 = arith.constant 16 : index
      %c0_44 = arith.constant 0 : index
      %45 = vector.load %arg8[%c0_43, %c16, %c0_44] : memref<2x128x128xf32, #tpu.memory_space<vmem>>, vector<1x16x128xf32>
      %46 = vector.shape_cast %45 : vector<1x16x128xf32> to vector<16x128xf32>
      %47 = vector.shape_cast %44 : vector<16x128xf32> to vector<1x16x128xf32>
      tpu.vector_store %arg8[%c0_43, %c16, %c0_44], %47 {strides = array<i32>} : memref<2x128x128xf32, #tpu.memory_space<vmem>>, vector<1x16x128xf32>,
      %48 = vector.extract_strided_slice %29 {offsets = [32, 0], sizes = [40, 128], strides = [1, 1]} : vector<128x128xbf16> to vector<40x128xbf16>
      %c0_45 = arith.constant 0 : index
      %c0_46 = arith.constant 0 : index
      %49 = vector.load %arg7[%c0_45, %c0_46] : memref<128x128xbf16, #tpu.memory_space<vmem>>, vector<128x128xbf16>
      %cst_47 = arith.constant dense<0.000000e+00> : vector<40x128xf32>
      %50 = tpu.matmul %48, %49, %cst_47 {dimension_numbers = #tpu.dot_dimension_numbers<[1], [0], [0], [1], [0, 0, 1, 1], [], []>} : vector<40x128xbf16>, vector<128x128xbf16>, vector<40x128xf32> -> vector<40x128xf32>
      %c0_48 = arith.constant 0 : index
      %c32 = arith.constant 32 : index
      %c0_49 = arith.constant 0 : index
      %51 = vector.load %arg8[%c0_48, %c32, %c0_49] : memref<2x128x128xf32, #tpu.memory_space<vmem>>, vector<1x40x128xf32>
      %52 = vector.shape_cast %51 : vector<1x40x128xf32> to vector<40x128xf32>
      %53 = vector.shape_cast %50 : vector<40x128xf32> to vector<1x40x128xf32>
      tpu.vector_store %arg8[%c0_48, %c32, %c0_49], %53 {strides = array<i32>} : memref<2x128x128xf32, #tpu.memory_space<vmem>>, vector<1x40x128xf32>,
      %c1_50 = arith.constant 1 : index
      %c0_51 = arith.constant 0 : index
      %c0_52 = arith.constant 0 : index
      %54 = vector.load %arg9[%c1_50, %c0_51, %c0_52] : memref<2x128x128xf32, #tpu.memory_space<vmem>>, vector<1x128x128xf32>
      %55 = vector.shape_cast %54 : vector<1x128x128xf32> to vector<128x128xf32>
      %56 = arith.truncf %55 : vector<128x128xf32> to vector<128x128xbf16>
      %57 = vector.extract_strided_slice %56 {offsets = [0, 0], sizes = [8, 128], strides = [1, 1]} : vector<128x128xbf16> to vector<8x128xbf16>
      %c0_53 = arith.constant 0 : index
      %c0_54 = arith.constant 0 : index
      %58 = vector.load %arg4[%c0_53, %c0_54] : memref<128x128xbf16, #tpu.memory_space<vmem>>, vector<128x128xbf16>
      %cst_55 = arith.constant dense<0.000000e+00> : vector<8x128xf32>
      %59 = tpu.matmul %57, %58, %cst_55 {dimension_numbers = #tpu.dot_dimension_numbers<[1], [0], [0], [1], [0, 0, 1, 1], [], []>} : vector<8x128xbf16>, vector<128x128xbf16>, vector<8x128xf32> -> vector<8x128xf32>
      %c1_56 = arith.constant 1 : index
      %c0_57 = arith.constant 0 : index
      %c0_58 = arith.constant 0 : index
      %60 = vector.load %arg8[%c1_56, %c0_57, %c0_58] : memref<2x128x128xf32, #tpu.memory_space<vmem>>, vector<1x8x128xf32>
      %61 = vector.shape_cast %60 : vector<1x8x128xf32> to vector<8x128xf32>
      %62 = vector.shape_cast %59 : vector<8x128xf32> to vector<1x8x128xf32>
      tpu.vector_store %arg8[%c1_56, %c0_57, %c0_58], %62 {strides = array<i32>} : memref<2x128x128xf32, #tpu.memory_space<vmem>>, vector<1x8x128xf32>,
      %63 = vector.extract_strided_slice %56 {offsets = [8, 0], sizes = [8, 128], strides = [1, 1]} : vector<128x128xbf16> to vector<8x128xbf16>
      %c0_59 = arith.constant 0 : index
      %c0_60 = arith.constant 0 : index
      %64 = vector.load %arg5[%c0_59, %c0_60] : memref<128x128xbf16, #tpu.memory_space<vmem>>, vector<128x128xbf16>
      %cst_61 = arith.constant dense<0.000000e+00> : vector<8x128xf32>
      %65 = tpu.matmul %63, %64, %cst_61 {dimension_numbers = #tpu.dot_dimension_numbers<[1], [0], [0], [1], [0, 0, 1, 1], [], []>} : vector<8x128xbf16>, vector<128x128xbf16>, vector<8x128xf32> -> vector<8x128xf32>
      %c1_62 = arith.constant 1 : index
      %c8_63 = arith.constant 8 : index
      %c0_64 = arith.constant 0 : index
      %66 = vector.load %arg8[%c1_62, %c8_63, %c0_64] : memref<2x128x128xf32, #tpu.memory_space<vmem>>, vector<1x8x128xf32>
      %67 = vector.shape_cast %66 : vector<1x8x128xf32> to vector<8x128xf32>
      %68 = vector.shape_cast %65 : vector<8x128xf32> to vector<1x8x128xf32>
      tpu.vector_store %arg8[%c1_62, %c8_63, %c0_64], %68 {strides = array<i32>} : memref<2x128x128xf32, #tpu.memory_space<vmem>>, vector<1x8x128xf32>,
      %69 = vector.extract_strided_slice %56 {offsets = [16, 0], sizes = [16, 128], strides = [1, 1]} : vector<128x128xbf16> to vector<16x128xbf16>
      %c0_65 = arith.constant 0 : index
      %c0_66 = arith.constant 0 : index
      %70 = vector.load %arg6[%c0_65, %c0_66] : memref<128x128xbf16, #tpu.memory_space<vmem>>, vector<128x128xbf16>
      %cst_67 = arith.constant dense<0.000000e+00> : vector<16x128xf32>
      %71 = tpu.matmul %69, %70, %cst_67 {dimension_numbers = #tpu.dot_dimension_numbers<[1], [0], [0], [1], [0, 0, 1, 1], [], []>} : vector<16x128xbf16>, vector<128x128xbf16>, vector<16x128xf32> -> vector<16x128xf32>
      %c1_68 = arith.constant 1 : index
      %c16_69 = arith.constant 16 : index
      %c0_70 = arith.constant 0 : index
      %72 = vector.load %arg8[%c1_68, %c16_69, %c0_70] : memref<2x128x128xf32, #tpu.memory_space<vmem>>, vector<1x16x128xf32>
      %73 = vector.shape_cast %72 : vector<1x16x128xf32> to vector<16x128xf32>
      %74 = vector.shape_cast %71 : vector<16x128xf32> to vector<1x16x128xf32>
      tpu.vector_store %arg8[%c1_68, %c16_69, %c0_70], %74 {strides = array<i32>} : memref<2x128x128xf32, #tpu.memory_space<vmem>>, vector<1x16x128xf32>,
      %75 = vector.extract_strided_slice %56 {offsets = [32, 0], sizes = [40, 128], strides = [1, 1]} : vector<128x128xbf16> to vector<40x128xbf16>
      %c0_71 = arith.constant 0 : index
      %c0_72 = arith.constant 0 : index
      %76 = vector.load %arg7[%c0_71, %c0_72] : memref<128x128xbf16, #tpu.memory_space<vmem>>, vector<128x128xbf16>
      %cst_73 = arith.constant dense<0.000000e+00> : vector<40x128xf32>
      %77 = tpu.matmul %75, %76, %cst_73 {dimension_numbers = #tpu.dot_dimension_numbers<[1], [0], [0], [1], [0, 0, 1, 1], [], []>} : vector<40x128xbf16>, vector<128x128xbf16>, vector<40x128xf32> -> vector<40x128xf32>
      %c1_74 = arith.constant 1 : index
      %c32_75 = arith.constant 32 : index
      %c0_76 = arith.constant 0 : index
      %78 = vector.load %arg8[%c1_74, %c32_75, %c0_76] : memref<2x128x128xf32, #tpu.memory_space<vmem>>, vector<1x40x128xf32>
      %79 = vector.shape_cast %78 : vector<1x40x128xf32> to vector<40x128xf32>
      %80 = vector.shape_cast %77 : vector<40x128xf32> to vector<1x40x128xf32>
      tpu.vector_store %arg8[%c1_74, %c32_75, %c0_76], %80 {strides = array<i32>} : memref<2x128x128xf32, #tpu.memory_space<vmem>>, vector<1x40x128xf32>,
    } else {
    }
    return
  }
  func.func @transform_0(%arg0: i32, %arg1: i32) -> (i32, i32, i32) {
    %c0_i32 = arith.constant 0 : i32
    %c0_i32_0 = arith.constant 0 : i32
    return %arg0, %arg1, %c0_i32 : i32, i32, i32
  }
  func.func @transform_1(%arg0: i32, %arg1: i32) -> (i32, i32) {
    %c0_i32 = arith.constant 0 : i32
    %c0_i32_0 = arith.constant 0 : i32
    return %c0_i32, %arg1 : i32, i32
  }
  func.func @transform_2(%arg0: i32, %arg1: i32) -> (i32, i32) {
    %c0_i32 = arith.constant 0 : i32
    %c0_i32_0 = arith.constant 0 : i32
    %c0_i32_1 = arith.constant 0 : i32
    return %c0_i32, %c0_i32_0 : i32, i32
  }
  func.func @transform_3(%arg0: i32, %arg1: i32) -> (i32, i32) {
    %c0_i32 = arith.constant 0 : i32
    %c0_i32_0 = arith.constant 0 : i32
    %c0_i32_1 = arith.constant 0 : i32
    return %c0_i32, %c0_i32_0 : i32, i32
  }
  func.func @transform_4(%arg0: i32, %arg1: i32) -> (i32, i32) {
    %c0_i32 = arith.constant 0 : i32
    %c0_i32_0 = arith.constant 0 : i32
    %c0_i32_1 = arith.constant 0 : i32
    return %c0_i32, %c0_i32_0 : i32, i32
  }
  func.func @transform_5(%arg0: i32, %arg1: i32) -> (i32, i32) {
    %c0_i32 = arith.constant 0 : i32
    %c0_i32_0 = arith.constant 0 : i32
    %c0_i32_1 = arith.constant 0 : i32
    return %c0_i32, %c0_i32_0 : i32, i32
  }
  func.func @transform_6(%arg0: i32, %arg1: i32) -> (i32, i32, i32) {
    %c0_i32 = arith.constant 0 : i32
    %c0_i32_0 = arith.constant 0 : i32
    %c0_i32_1 = arith.constant 0 : i32
    return %arg0, %c0_i32, %c0_i32_0 : i32, i32, i32
  }
}

</mosaic_0001>

<bundles_post_ra>
// kernel: tpu_custom_call.1
= control target key start
LH: loop header
LB: loop body
LE: loop exit
PB: predicated region body
PF: predicated region fallthrough
CT: control target
= control target key end

     0   :  { %11 = vsyncpa [#allocation4], 0  ;;  %s2802_s0 = inlined_call_operand.hbm [shape: bf16[2,256,128], index: 0, kind: input, shape index: {}]   ;;  %s2803_s1 = inlined_call_operand.hbm [shape: bf16[128,256], index: 1, kind: input, shape index: {}]   ;;  %s2804_s2 = inlined_call_operand.hbm [shape: bf16[128,128], index: 2, kind: input, shape index: {}]   ;;  %s2805_s3 = inlined_call_operand.hbm [shape: bf16[128,128], index: 3, kind: input, shape index: {}]   ;;  %s2806_s4 = inlined_call_operand.hbm [shape: bf16[128,128], index: 4, kind: input, shape index: {}]   ;;  %s2807_s5 = inlined_call_operand.hbm [shape: bf16[128,128], index: 5, kind: input, shape index: {}]   ;;  %s2808_s6 = inlined_call_operand.hbm [shape: f32[2,128,128], index: 6, kind: output, shape index: {}]  }
   0x1   :  { %12 = vsyncpa [#allocation7], 0 }
   0x2   :  { %13 = vsyncpa [#allocation10], 0 }
   0x3   :  { %14 = vsyncpa [#allocation13], 0 }
   0x4   :  { %15 = vsyncpa [#allocation5], 0  ;;  %s2539_s21 = smov [#allocation6]  }
   0x5   :  { %s33_s22 = sshll.u32 %s2539_s21, 4  ;;  %s34_s22 = int_to_ptr.vmem [resolvable:$true] %s33_s22 }
   0x6   :  { %s2397_s23 = scalar_lea.vmem %s34_s22, 2048  ;;  %p2402_p1 = scmp.lt.s32.totalorder %s34_s22, %s34_s22 }
   0x7   :  { %p2398_p0 = scmp.ne.s32.totalorder %s34_s22, %s2397_s23  ;;  %p2403_p2 = scmp.lt.s32.totalorder %s2397_s23, %s2397_s23 }
   0x9   :  { %p2404_p3 = por %p2403_p2, %p2402_p1 }
   0xb   :  { %p2405_p4 = pnand %p2404_p3, %p2398_p0 }
   0xd   :  { %2408 = shalt.err (!%p2405_p4)
}
   0xe   :  { %s2540_s24 = smov 128   ;;  %s2541_s25 = smov 8  }
   0xf   :  { %39 = dma.hbm_to_vmem [thread:$0]  %s2803_s1, 2048, %s34_s22, [#allocation7], %s2540_s24, %s2540_s24, %s2541_s25  }
  0x10   :  { %s2542_s28 = smov [#allocation9]   ;;  %s2543_s30 = smov [#allocation3]  }
  0x11   :  { %s57_s29 = sshll.u32 %s2542_s28, 4  ;;  %s21_s7 = sshll.u32 %s2543_s30, 4  ;;  %s58_s29 = int_to_ptr.vmem [resolvable:$true] %s57_s29  ;;  %s22_s7 = int_to_ptr.vmem [resolvable:$true] %s21_s7 }
  0x12   :  { %s2417_s8 = scalar_lea.vmem %s58_s29, 1024  ;;  %p2422_p6 = scmp.lt.s32.totalorder %s58_s29, %s58_s29 }
  0x13   :  { %p2418_p5 = scmp.ne.s32.totalorder %s58_s29, %s2417_s8  ;;  %p2423_p7 = scmp.lt.s32.totalorder %s2417_s8, %s2417_s8 }
  0x15   :  { %p2424_p8 = por %p2423_p7, %p2422_p6 }
  0x17   :  { %p2425_p9 = pnand %p2424_p8, %p2418_p5 }
  0x19   :  { %2428 = shalt.err (!%p2425_p9)
}
  0x1a   :  { %s2544_s9 = smov 64   ;;  %s2545_s10 = smov 4  }
  0x1b   :  { %63 = dma.hbm_to_vmem [thread:$0]  %s2805_s3, 1024, %s58_s29, [#allocation10], %s2544_s9, %s2544_s9, %s2545_s10  }
  0x1c   :  { %s2437_s1 = scalar_lea.vmem %s22_s7, 4096  ;;  %p2442_p11 = scmp.lt.s32.totalorder %s22_s7, %s22_s7 }
  0x1d   :  { %p2438_p10 = scmp.ne.s32.totalorder %s22_s7, %s2437_s1  ;;  %p2443_p12 = scmp.lt.s32.totalorder %s2437_s1, %s2437_s1 }
  0x1f   :  { %p2444_p13 = por %p2443_p12, %p2442_p11 }
  0x21   :  { %p2445_p0 = pnand %p2444_p13, %p2438_p10 }
  0x23   :  { %2448 = shalt.err (!%p2445_p0)
}
  0x24   :  { %27 = dma.hbm_to_vmem [thread:$0]  %s2802_s0, 4096, %s22_s7, [#allocation4], %s2544_s9, %s2544_s9, %s2545_s10  }
  0x25   :  { %s2546_s15 = smov [#allocation8]   ;;  %s2547_s17 = smov [#allocation11]  }
  0x26   :  { %s45_s16 = sshll.u32 %s2546_s15, 4  ;;  %s69_s3 = sshll.u32 %s2547_s17, 4  ;;  %s46_s16 = int_to_ptr.vmem [resolvable:$true] %s45_s16  ;;  %s70_s3 = int_to_ptr.vmem [resolvable:$true] %s69_s3 }
  0x27   :  { %s2457_s18 = scalar_lea.vmem %s46_s16, 1024  ;;  %p2462_p2 = scmp.lt.s32.totalorder %s46_s16, %s46_s16 }
  0x28   :  { %p2458_p1 = scmp.ne.s32.totalorder %s46_s16, %s2457_s18  ;;  %p2463_p3 = scmp.lt.s32.totalorder %s2457_s18, %s2457_s18 }
  0x2a   :  { %p2464_p4 = por %p2463_p3, %p2462_p2 }
  0x2c   :  { %p2465_p5 = pnand %p2464_p4, %p2458_p1 }
  0x2e   :  { %2468 = shalt.err (!%p2465_p5)
}
  0x2f   :  { %51 = dma.hbm_to_vmem [thread:$0]  %s2804_s2, 1024, %s46_s16, [#allocation7], %s2544_s9, %s2544_s9, %s2545_s10  }
  0x30   :  { %s2477_s0 = scalar_lea.vmem %s70_s3, 1024  ;;  %p2482_p7 = scmp.lt.s32.totalorder %s70_s3, %s70_s3 }
  0x31   :  { %p2478_p6 = scmp.ne.s32.totalorder %s70_s3, %s2477_s0  ;;  %p2483_p8 = scmp.lt.s32.totalorder %s2477_s0, %s2477_s0 }
  0x33   :  { %p2484_p9 = por %p2483_p8, %p2482_p7 }
  0x35   :  { %p2485_p10 = pnand %p2484_p9, %p2478_p6 }
  0x37   :  { %2488 = shalt.err (!%p2485_p10)
}
  0x38   :  { %75 = dma.hbm_to_vmem [thread:$0]  %s2806_s4, 1024, %s70_s3, [#allocation10], %s2544_s9, %s2544_s9, %s2545_s10  }
  0x39   :  { %s2548_s23 = smov [#allocation12]  }
  0x3a   :  { %s81_s26 = sshll.u32 %s2548_s23, 4  ;;  %s82_s26 = int_to_ptr.vmem [resolvable:$true] %s81_s26 }
  0x3b   :  { %s2497_s27 = scalar_lea.vmem %s82_s26, 1024  ;;  %p2502_p12 = scmp.lt.s32.totalorder %s82_s26, %s82_s26 }
  0x3c   :  { %p2498_p11 = scmp.ne.s32.totalorder %s82_s26, %s2497_s27  ;;  %p2503_p13 = scmp.lt.s32.totalorder %s2497_s27, %s2497_s27 }
  0x3e   :  { %p2504_p0 = por %p2503_p13, %p2502_p12 }
  0x40   :  { %p2505_p1 = pnand %p2504_p0, %p2498_p11 }
  0x42   :  { %2508 = shalt.err (!%p2505_p1)
}
  0x43   :  { %87 = dma.hbm_to_vmem [thread:$0]  %s2807_s5, 1024, %s82_s26, [#allocation13], %s2544_s9, %s2544_s9, %s2545_s10  }
  0x44   :  { %2529 = dma.done.wait [#allocation4], 4096  }
  0x45   :  { %2530 = vsyncadd [#allocation4], 4294963200 }
  0x46   :  { %2531 = dma.done.wait [#allocation7], 3072  }
  0x47   :  { %2532 = vsyncadd [#allocation7], 4294964224 }
  0x48   :  { %2533 = dma.done.wait [#allocation10], 2048  }
  0x49   :  { %2534 = vsyncadd [#allocation10], 4294965248 }
  0x4a   :  { %2535 = dma.done.wait [#allocation13], 1024  }
  0x4b   :  { %2536 = vsyncadd [#allocation13], 4294966272  ;;  %v2549_v0 = vmov 0.0   ;;  %v2268_v1 = vld [vmem:[#allocation3 + $0x78] sm:$0xff]   ;;  %v2270_v3 = vld [vmem:[#allocation3 + $0x70] sm:$0xff]   ;;  %vm2550_vm0 = vmmov 0  }
  0x4c   :  { %799 = vst [vmem:[#allocation14 + $0x48] sm:$0xff] %v2549_v0  ;;  %800 = vst [vmem:[#allocation14 + $0x50] sm:$0xff] %v2549_v0  ;;  %v2269_v2 = vld [vmem:[#allocation3 + $0x38] sm:$0xff]   ;;  %1875 = vmatprep.subr.bf16.mxu0 %v2268_v1  ;;  %v2271_v4 = vld [vmem:[#allocation3 + $0x30] sm:$0xff]   ;;  %s2551_s4 = smov [#allocation14]  }
  0x4d   :  { %801 = vst [vmem:[#allocation14 + $0x58] sm:$0xff] %v2549_v0  ;;  %802 = vst [vmem:[#allocation14 + $0x60] sm:$0xff] %v2549_v0  ;;  %1876 = vmatpush3.bf16.msra.mxu0 %v2269_v2  ;;  %v2272_v5 = vld [vmem:[#allocation3 + $0x68] sm:$0xff]   ;;  %v2274_v7 = vld [vmem:[#allocation3 + $0x60] sm:$0xff]   ;;  %s1748_s5 = sshll.u32 %s2551_s4, 4  ;;  %s1749_s5 = int_to_ptr.vmem [resolvable:$true] %s1748_s5 }
  0x4e   :  { %803 = vst [vmem:[#allocation14 + $0x68] sm:$0xff] %v2549_v0  ;;  %804 = vst [vmem:[#allocation14 + $0x70] sm:$0xff] %v2549_v0  ;;  %1877 = vmatprep.subr.bf16.mxu0 %v2270_v3  ;;  %v2273_v6 = vld [vmem:[#allocation3 + $0x28] sm:$0xff]   ;;  %v2275_v8 = vld [vmem:[#allocation3 + $0x20] sm:$0xff]   ;;  %s2509_s29 = scalar_lea.vmem %s1749_s5, 4096  ;;  %p2514_p3 = scmp.lt.s32.totalorder %s1749_s5, %s1749_s5 }
  0x4f   :  { %805 = vst [vmem:[#allocation14 + $0x78] sm:$0xff] %v2549_v0  ;;  %815 = vst [vmem:[#allocation14 + $0xc8] sm:$0xff] %v2549_v0  ;;  %v2276_v9 = vld [vmem:[#allocation3 + $0x58] sm:$0xff]   ;;  %v2278_v11 = vld [vmem:[#allocation3 + $0x50] sm:$0xff]   ;;  %p2510_p2 = scmp.ne.s32.totalorder %s1749_s5, %s2509_s29  ;;  %p2515_p4 = scmp.lt.s32.totalorder %s2509_s29, %s2509_s29 }
  0x50   :  { %816 = vst [vmem:[#allocation14 + $0xd0] sm:$0xff] %v2549_v0  ;;  %817 = vst [vmem:[#allocation14 + $0xd8] sm:$0xff] %v2549_v0  ;;  %v2277_v10 = vld [vmem:[#allocation3 + $0x18] sm:$0xff]   ;;  %v2286_v12 = vld [vmem:[#allocation6 + $0x4] ss:$8 sps:$4 sm:$0xff]  }
  0x51   :  { %818 = vst [vmem:[#allocation14 + $0xe0] sm:$0xff] %v2549_v0  ;;  %819 = vst [vmem:[#allocation14 + $0xe8] sm:$0xff] %v2549_v0  ;;  %1878 = vmatpush3.bf16.msra.mxu0 %v2271_v4  ;;  %v2279_v13 = vld [vmem:[#allocation3 + $0x10] sm:$0xff]   ;;  %415 = vmatprep.mubr.bf16.mxu0 %v2286_v12  ;;  %v2290_v14 = vld [vmem:[#allocation3 + $0xf8] sm:$0xff]   ;;  %p2516_p5 = por %p2515_p4, %p2514_p3 }
  0x52   :  { %820 = vst [vmem:[#allocation14 + $0xf0] sm:$0xff] %v2549_v0  ;;  %821 = vst [vmem:[#allocation14 + $0xf8] sm:$0xff] %v2549_v0  ;;  %1879 = vmatprep.subr.bf16.mxu0 %v2272_v5  ;;  %v2280_v15 = vld [vmem:[#allocation3 + $0x48] sm:$0xff]   ;;  %690 = vmatprep.mubr.bf16.mxu1 %v2286_v12  ;;  %v2293_v17 = vld [vmem:[#allocation3 + $0xb8] sm:$0xff]  }
  0x53   :  { %v2281_v16 = vld [vmem:[#allocation3 + $0x8] sm:$0xff]   ;;  %1939 = vmatprep.subr.bf16.mxu1 %v2290_v14  ;;  %v2282_v18 = vld [vmem:[#allocation3 + $0x40] sm:$0xff]   ;;  %v2295_v19 = vld [vmem:[#allocation3 + $0xf0] sm:$0xff]   ;;  %p2517_p6 = pnand %p2516_p5, %p2510_p2 }
  0x54   :  { %1940 = vmatpush3.bf16.msra.mxu1 %v2293_v17  ;;  %v2296_v20 = vld [vmem:[#allocation3 + $0xb0] sm:$0xff]   ;;  %v2297_v21 = vld [vmem:[#allocation3 + $0xe8] sm:$0xff]   ;;  %v2283_v22 = vld [vmem:[#allocation3] sm:$0xff]  }
  0x55   :  { %1880 = vmatpush3.bf16.msra.mxu0 %v2273_v6  ;;  %1941 = vmatprep.subr.bf16.mxu1 %v2295_v19  ;;  %v2298_v23 = vld [vmem:[#allocation3 + $0xa8] sm:$0xff]   ;;  %v2299_v24 = vld [vmem:[#allocation3 + $0xe0] sm:$0xff]   ;;  %v2287_v26 = vld [vmem:[#allocation6 + $0x14] ss:$8 sps:$4 sm:$0xff]  }
  0x56   :  { %1881 = vmatprep.subr.bf16.mxu0 %v2274_v7  ;;  %v2284_v25 = vld [vmem:[#allocation6] ss:$8 sps:$4 sm:$0xff]   ;;  %v2304_v28 = vld [vmem:[#allocation3 + $0xd8] sm:$0xff]   ;;  %v2306_v30 = vld [vmem:[#allocation3 + $0xd0] sm:$0xff]  }
  0x57   :  { %v2300_v27 = vld [vmem:[#allocation3 + $0xa0] sm:$0xff]   ;;  %v2305_v29 = vld [vmem:[#allocation3 + $0x98] sm:$0xff]   ;;  %v2307_v33 = vld [vmem:[#allocation3 + $0x90] sm:$0xff]  }
  0x58   :  { %1942 = vmatpush3.bf16.msra.mxu1 %v2296_v20  ;;  %v2289_v31 = vld [vmem:[#allocation6 + $0x10] ss:$8 sps:$4 sm:$0xff]   ;;  %v2291_v32 = vld [vmem:[#allocation6 + $0x24] ss:$8 sps:$4 sm:$0xff]   ;;  %v2294_v39 = vld [vmem:[#allocation6 + $0x20] ss:$8 sps:$4 sm:$0xff]  }
  0x59   :  { %1882 = vmatpush3.bf16.msra.mxu0 %v2275_v8  ;;  %1943 = vmatprep.subr.bf16.mxu1 %v2297_v21  ;;  %v2311_v34 = vld [vmem:[#allocation3 + $0xc8] sm:$0xff]   ;;  %v2317_v35 = vld [vmem:[#allocation8 + $0x38] sm:$0xff]   ;;  %v2313_v37 = vld [vmem:[#allocation3 + $0xc0] sm:$0xff]  }
  0x5a   :  { %1883 = vmatprep.subr.bf16.mxu0 %v2276_v9  ;;  %v2312_v36 = vld [vmem:[#allocation3 + $0x88] sm:$0xff]   ;;  %v2319_v38 = vld [vmem:[#allocation8 + $0x30] sm:$0xff]   ;;  %v2314_v41 = vld [vmem:[#allocation3 + $0x80] sm:$0xff]  }
  0x5b   :  { %v2301_v40 = vld [vmem:[#allocation6 + $0x34] ss:$8 sps:$4 sm:$0xff]   ;;  %v2321_v42 = vld [vmem:[#allocation8 + $0x28] sm:$0xff]   ;;  %v2326_v44 = vld [vmem:[#allocation8 + $0x20] sm:$0xff]  }
  0x5c   :  { %1944 = vmatpush3.bf16.msra.mxu1 %v2298_v23  ;;  %v2315_v43 = vld [vmem:[#allocation9 + $0x38] sm:$0xff]   ;;  %v2308_v46 = vld [vmem:[#allocation6 + $0x44] ss:$8 sps:$4 sm:$0xff]   ;;  %v2316_v47 = vld [vmem:[#allocation9 + $0x30] sm:$0xff]  }
  0x5d   :  { %1884 = vmatpush3.bf16.msra.mxu0 %v2277_v10  ;;  %1945 = vmatprep.subr.bf16.mxu1 %v2299_v24  ;;  %v2303_v45 = vld [vmem:[#allocation6 + $0x30] ss:$8 sps:$4 sm:$0xff]   ;;  %v2318_v49 = vld [vmem:[#allocation9 + $0x28] sm:$0xff]   ;;  %v2320_v52 = vld [vmem:[#allocation9 + $0x20] sm:$0xff]  }
  0x5e   :  { %1885 = vmatprep.subr.bf16.mxu0 %v2278_v11  ;;  %v2331_v48 = vld [vmem:[#allocation8 + $0x18] sm:$0xff]   ;;  %v2336_v50 = vld [vmem:[#allocation8 + $0x10] sm:$0xff]   ;;  %v2310_v51 = vld [vmem:[#allocation6 + $0x40] ss:$8 sps:$4 sm:$0xff]  }
  0x5f   :  { %v2323_v53 = vld [vmem:[#allocation6 + $0x54] ss:$8 sps:$4 sm:$0xff]   ;;  %v2325_v56 = vld [vmem:[#allocation6 + $0x50] ss:$8 sps:$4 sm:$0xff]   ;;  %v2328_v57 = vld [vmem:[#allocation6 + $0x64] ss:$8 sps:$4 sm:$0xff]  }
  0x60   :  { %1946 = vmatpush3.bf16.msra.mxu1 %v2300_v27  ;;  %v2322_v54 = vld [vmem:[#allocation9 + $0x18] sm:$0xff]   ;;  %v2327_v55 = vld [vmem:[#allocation9 + $0x10] sm:$0xff]   ;;  %v2332_v58 = vld [vmem:[#allocation9 + $0x8] sm:$0xff]  }
  0x61   :  { %1886 = vmatpush3.bf16.msra.mxu0 %v2279_v13  ;;  %1947 = vmatprep.subr.bf16.mxu1 %v2304_v28  ;;  %v2330_v59 = vld [vmem:[#allocation6 + $0x60] ss:$8 sps:$4 sm:$0xff]   ;;  %v2333_v60 = vld [vmem:[#allocation6 + $0x74] ss:$8 sps:$4 sm:$0xff]   ;;  %v2335_v61 = vld [vmem:[#allocation6 + $0x70] ss:$8 sps:$4 sm:$0xff]  }
  0x62   :  { %1887 = vmatprep.subr.bf16.mxu0 %v2280_v15  ;;  %v2337_v62 = vld [vmem:[#allocation8 + $0x8] sm:$0xff]   ;;  %v2338_v63 = vld [vmem:[#allocation9] sm:$0xff]   ;;  %v2340_v8 = vld [vmem:[#allocation11 + $0x38] sm:$0xff]  }
  0x63   :  { %v2339_v1 = vld [vmem:[#allocation8] sm:$0xff]   ;;  %v2341_v11 = vld [vmem:[#allocation12 + $0x38] sm:$0xff]   ;;  %v2342_v14 = vld [vmem:[#allocation11 + $0x30] sm:$0xff]  }
  0x64   :  { %1948 = vmatpush3.bf16.msra.mxu1 %v2305_v29  ;;  %v2345_v20 = vld [vmem:[#allocation12 + $0x28] sm:$0xff]   ;;  %v2348_v28 = vld [vmem:[#allocation11 + $0x18] sm:$0xff]  }
  0x65   :  { %1888 = vmatpush3.bf16.msra.mxu0 %v2281_v16  ;;  %1949 = vmatprep.subr.bf16.mxu1 %v2306_v30  ;;  %v2343_v16 = vld [vmem:[#allocation12 + $0x30] sm:$0xff]  }
  0x66   :  { %1889 = vmatprep.subr.bf16.mxu0 %v2282_v18  ;;  %v2344_v18 = vld [vmem:[#allocation11 + $0x28] sm:$0xff]  }
  0x68   :  { %1950 = vmatpush3.bf16.msra.mxu1 %v2307_v33 }
  0x69   :  { %1890 = vmatpush3.bf16.msra.mxu0 %v2283_v22  ;;  %1951 = vmatprep.subr.bf16.mxu1 %v2311_v34  ;;  %v2346_v22 = vld [vmem:[#allocation11 + $0x20] sm:$0xff]   ;;  %v2350_v34 = vld [vmem:[#allocation11 + $0x10] sm:$0xff]  }
  0x6a   :  { %2079 = vmatprep.subr.bf16.mxu0 %v2549_v0 }
  0x6c   :  { %416 = vmatmul.mubr.bf16.vlgmr.msra.gmra.mxu0 %v2284_v25  ;;  %1952 = vmatpush3.bf16.msra.mxu1 %v2312_v36 }
  0x6d   :  { %423 = vmatprep.mubr.bf16.mxu0 %v2287_v26  ;;  %2080 = vmatpush3.bf16.msra.mxu0 %v2317_v35 }
  0x6e   :  { %2081 = vmatprep.subr.bf16.mxu0 %v2549_v0  ;;  %1953 = vmatprep.subr.bf16.mxu1 %v2313_v37  ;;  %v2351_v37 = vld [vmem:[#allocation12 + $0x10] sm:$0xff]  }
  0x70   :  { %1954 = vmatpush3.bf16.msra.mxu1 %v2314_v41  ;;  %v2352_v41 = vld [vmem:[#allocation11 + $0x8] sm:$0xff]  }
  0x71   :  { %2082 = vmatpush3.bf16.msra.mxu0 %v2319_v38  ;;  %2099 = vmatprep.subr.bf16.mxu1 %v2549_v0 }
  0x72   :  { %2083 = vmatprep.subr.bf16.mxu0 %v2549_v0 }
  0x73   :  { %691 = vmatmul.mubr.bf16.vlgmr.msra.gmra.mxu1 %v2284_v25  ;;  %v2347_v25 = vld [vmem:[#allocation12 + $0x20] sm:$0xff]  }
  0x74   :  { %424 = vmatmul.mubr.bf16.gmra.mxu0 %v2289_v31  ;;  %698 = vmatprep.mubr.bf16.mxu1 %v2287_v26 }
  0x75   :  { %431 = vmatprep.mubr.bf16.mxu0 %v2291_v32  ;;  %2084 = vmatpush3.bf16.msra.mxu0 %v2321_v42 }
  0x76   :  { %2085 = vmatprep.subr.bf16.mxu0 %v2549_v0  ;;  %2100 = vmatpush3.bf16.msra.mxu1 %v2315_v43 }
  0x77   :  { %2101 = vmatprep.subr.bf16.mxu1 %v2549_v0 }
  0x79   :  { %2086 = vmatpush3.bf16.msra.mxu0 %v2326_v44  ;;  %v2353_v44 = vld [vmem:[#allocation12 + $0x8] sm:$0xff]  }
  0x7a   :  { %2087 = vmatprep.subr.bf16.mxu0 %v2549_v0  ;;  %2102 = vmatpush3.bf16.msra.mxu1 %v2316_v47 }
  0x7b   :  { %2103 = vmatprep.subr.bf16.mxu1 %v2549_v0  ;;  %699 = vmatmul.mubr.bf16.gmra.mxu1 %v2289_v31  ;;  %v2349_v31 = vld [vmem:[#allocation12 + $0x18] sm:$0xff]  }
  0x7c   :  { %432 = vmatmul.mubr.bf16.gmra.mxu0 %v2294_v39  ;;  %706 = vmatprep.mubr.bf16.mxu1 %v2291_v32 }
  0x7d   :  { %439 = vmatprep.mubr.bf16.mxu0 %v2301_v40  ;;  %2088 = vmatpush3.bf16.msra.mxu0 %v2331_v48  ;;  %v2354_v48 = vld [vmem:[#allocation11] sm:$0xff]  }
  0x7e   :  { %2089 = vmatprep.subr.bf16.mxu0 %v2549_v0  ;;  %2104 = vmatpush3.bf16.msra.mxu1 %v2318_v49 }
  0x7f   :  { %2105 = vmatprep.subr.bf16.mxu1 %v2549_v0 }
  0x81   :  { %2090 = vmatpush3.bf16.msra.mxu0 %v2336_v50 }
  0x82   :  { %2091 = vmatprep.subr.bf16.mxu0 %v2549_v0  ;;  %2106 = vmatpush3.bf16.msra.mxu1 %v2320_v52 }
  0x83   :  { %2107 = vmatprep.subr.bf16.mxu1 %v2549_v0  ;;  %707 = vmatmul.mubr.bf16.gmra.mxu1 %v2294_v39 }
  0x84   :  { %440 = vmatmul.mubr.bf16.gmra.mxu0 %v2303_v45  ;;  %714 = vmatprep.mubr.bf16.mxu1 %v2301_v40 }
  0x85   :  { %447 = vmatprep.mubr.bf16.mxu0 %v2308_v46  ;;  %2092 = vmatpush3.bf16.msra.mxu0 %v2337_v62 }
  0x86   :  { %2108 = vmatpush3.bf16.msra.mxu1 %v2322_v54  ;;  %2093 = vmatprep.subr.bf16.mxu0 %v2549_v0  ;;  %v2355_v54 = vld [vmem:[#allocation12] sm:$0xff]  }
  0x87   :  { %2109 = vmatprep.subr.bf16.mxu1 %v2549_v0 }
  0x89   :  { %2094 = vmatpush3.bf16.msra.mxu0 %v2339_v1  ;;  %v2357_v1 = vld [vmem:[#allocation9 + $0x38] sm:$0xff]  }
  0x8a   :  { %2110 = vmatpush3.bf16.msra.mxu1 %v2327_v55  ;;  %2119 = vmatprep.subr.bf16.mxu0 %v2549_v0 }
  0x8b   :  { %2111 = vmatprep.subr.bf16.mxu1 %v2549_v0  ;;  %715 = vmatmul.mubr.bf16.gmra.mxu1 %v2303_v45 }
  0x8c   :  { %448 = vmatmul.mubr.bf16.gmra.mxu0 %v2310_v51  ;;  %722 = vmatprep.mubr.bf16.mxu1 %v2308_v46 }
  0x8d   :  { %455 = vmatprep.mubr.bf16.mxu0 %v2323_v53 }
  0x8e   :  { %2112 = vmatpush3.bf16.msra.mxu1 %v2332_v58 }
  0x8f   :  { %2113 = vmatprep.subr.bf16.mxu1 %v2549_v0 }
  0x92   :  { %2114 = vmatpush3.bf16.msra.mxu1 %v2338_v63 }
  0x93   :  { %723 = vmatmul.mubr.bf16.gmra.mxu1 %v2310_v51  ;;  %2139 = vmatprep.subr.bf16.mxu1 %v2549_v0 }
  0x94   :  { %456 = vmatmul.mubr.bf16.gmra.mxu0 %v2325_v56  ;;  %730 = vmatprep.mubr.bf16.mxu1 %v2323_v53 }
  0x95   :  { %463 = vmatprep.mubr.bf16.mxu0 %v2328_v57 }
  0x9b   :  { %731 = vmatmul.mubr.bf16.gmra.mxu1 %v2325_v56 }
  0x9c   :  { %464 = vmatmul.mubr.bf16.gmra.mxu0 %v2330_v59  ;;  %738 = vmatprep.mubr.bf16.mxu1 %v2328_v57 }
  0x9d   :  { %471 = vmatprep.mubr.bf16.mxu0 %v2333_v60 }
  0xa3   :  { %739 = vmatmul.mubr.bf16.gmra.mxu1 %v2330_v59 }
  0xa4   :  { %472 = vmatmul.mubr.bf16.gmra.mxu0 %v2335_v61  ;;  %746 = vmatprep.mubr.bf16.mxu1 %v2333_v60  ;;  %v2356_v60 = vld [vmem:[#allocation8 + $0x38] sm:$0xff]  }
  0xa5   :  { %2095 = vmatprep.mubr.msk.bf16.mxu0 %vm2550_vm0, %v2549_v0 }
  0xab   :  { %747 = vmatmul.mubr.bf16.gmra.mxu1 %v2335_v61 }
  0xac   :  { %2115 = vmatprep.mubr.msk.bf16.mxu1 %vm2550_vm0, %v2549_v0 }
 0x12c   :  { %v1891_v2 = vpop.f32.mrf.mxu0 }
 0x12e   :  { %v1892_v3 = vpop.f32.mrf.mxu0 }
 0x12f   :  { %v1893_v6 = vadd.f32 %v1892_v3, %v1891_v2 }
 0x130   :  { %v1894_v4 = vpop.f32.mrf.mxu0 }
 0x132   :  { %v1895_v5 = vpop.f32.mrf.mxu0 }
 0x133   :  { %v1896_v7 = vadd.f32 %v1895_v5, %v1894_v4  ;;  %v2673_v24 = vpop.f32.mrf.mxu1 }
 0x134   :  { %v2659_v9 = vpop.f32.mrf.mxu0 }
 0x135   :  { %v832_v10 = vpack.c.bf16 %v1896_v7, %v1893_v6  ;;  %v2676_v27 = vpop.f32.mrf.mxu1  ;;  %v2358_v6 = vld [vmem:[#allocation8 + $0x30] sm:$0xff]  }
 0x136   :  { %v2661_v12 = vpop.f32.mrf.mxu0 }
 0x137   :  { %v959_v13 = vrot.slane %v832_v10, 4  ;;  %2096 = vmatmul.mubr.bf16.vlgmr.msra.gmra.mxu0 %v832_v10  ;;  %v2681_v30 = vpop.f32.mrf.mxu1  ;;  %v1899_v51 = vadd.f32 %v2661_v12, %v2659_v9  ;;  %v2359_v12 = vld [vmem:[#allocation9 + $0x30] sm:$0xff]  }
 0x138   :  { %2120 = vmatpush3.bf16.msra.mxu0 %v2340_v8  ;;  %v2663_v15 = vpop.f32.mrf.mxu0  ;;  %2135 = vmatprep.mubr.msk.bf16.mxu0 %vm2550_vm0, %v2549_v0 }
 0x139   :  { %2116 = vmatmul.mubr.bf16.vlgmr.msra.gmra.mxu1 %v959_v13  ;;  %2121 = vmatprep.subr.bf16.mxu0 %v2549_v0  ;;  %v2684_v33 = vpop.f32.mrf.mxu1 }
 0x13a   :  { %2140 = vmatpush3.bf16.msra.mxu1 %v2341_v11  ;;  %v1901_v17 = vpop.f32.mrf.mxu0  ;;  %2155 = vmatprep.mubr.msk.bf16.mxu1 %vm2550_vm0, %v2549_v0 }
 0x13b   :  { %2141 = vmatprep.subr.bf16.mxu1 %v2549_v0  ;;  %v1961_v36 = vpop.f32.mrf.mxu1  ;;  %v1902_v52 = vadd.f32 %v1901_v17, %v2663_v15 }
 0x13c   :  { %2122 = vmatpush3.bf16.msra.mxu0 %v2342_v14  ;;  %v1903_v19 = vpop.f32.mrf.mxu0 }
 0x13d   :  { %2123 = vmatprep.subr.bf16.mxu0 %v2549_v0  ;;  %v1962_v39 = vpop.f32.mrf.mxu1  ;;  %v833_v63 = vpack.c.bf16 %v1902_v52, %v1899_v51  ;;  %v2367_v52 = vld [vmem:[#allocation9 + $0x10] sm:$0xff]  }
 0x13e   :  { %2142 = vmatpush3.bf16.msra.mxu1 %v2343_v16  ;;  %v1904_v21 = vpop.f32.mrf.mxu0  ;;  %v2689_v40 = vadd.f32 %v1962_v39, %v1961_v36  ;;  %v2360_v16 = vld [vmem:[#allocation8 + $0x28] sm:$0xff]  }
 0x13f   :  { %2143 = vmatprep.subr.bf16.mxu1 %v2549_v0  ;;  %v1964_v43 = vpop.f32.mrf.mxu1  ;;  %v1905_v57 = vadd.f32 %v1904_v21, %v1903_v19  ;;  %v2361_v21 = vld [vmem:[#allocation9 + $0x28] sm:$0xff]  }
 0x140   :  { %2124 = vmatpush3.bf16.msra.mxu0 %v2344_v18  ;;  %v1906_v23 = vpop.f32.mrf.mxu0 }
 0x141   :  { %2125 = vmatprep.subr.bf16.mxu0 %v2549_v0  ;;  %v1965_v46 = vpop.f32.mrf.mxu1 }
 0x142   :  { %2144 = vmatpush3.bf16.msra.mxu1 %v2345_v20  ;;  %v1907_v26 = vpop.f32.mrf.mxu0  ;;  %v2697_v47 = vadd.f32 %v1965_v46, %v1964_v43  ;;  %v2725_v20 = vld [vmem:[#allocation14 + $0x48] sm:$0xff]  ;;  %v2365_v43 = vld [vmem:[#allocation9 + $0x18] sm:$0xff]  }
 0x143   :  { %2145 = vmatprep.subr.bf16.mxu1 %v2549_v0  ;;  %v1967_v50 = vpop.f32.mrf.mxu1  ;;  %v1908_v58 = vadd.f32 %v1907_v26, %v1906_v23 }
 0x144   :  { %2126 = vmatpush3.bf16.msra.mxu0 %v2346_v22  ;;  %v2679_v29 = vpop.f32.mrf.mxu0  ;;  %v1293_v53 = vpack.c.bf16 %v2697_v47, %v2689_v40 }
 0x145   :  { %2127 = vmatprep.subr.bf16.mxu0 %v2549_v0  ;;  %v1968_v56 = vpop.f32.mrf.mxu1  ;;  %v834_v4 = vpack.c.bf16 %v1908_v58, %v1905_v57  ;;  %v2369_v58 = vld [vmem:[#allocation9 + $0x8] sm:$0xff]  }
 0x146   :  { %2146 = vmatpush3.bf16.msra.mxu1 %v2347_v25  ;;  %v1910_v32 = vpop.f32.mrf.mxu0  ;;  %v2708_v59 = vadd.f32 %v1968_v56, %v1967_v50  ;;  %v2368_v56 = vld [vmem:[#allocation8 + $0x8] sm:$0xff]  }
 0x147   :  { %2147 = vmatprep.subr.bf16.mxu1 %v2549_v0  ;;  %v1970_v61 = vpop.f32.mrf.mxu1  ;;  %v1911_v9 = vadd.f32 %v1910_v32, %v2679_v29 }
 0x148   :  { %2128 = vmatpush3.bf16.msra.mxu0 %v2348_v28  ;;  %v1912_v35 = vpop.f32.mrf.mxu0 }
 0x149   :  { %2129 = vmatprep.subr.bf16.mxu0 %v2549_v0  ;;  %v1971_v2 = vpop.f32.mrf.mxu1 }
 0x14a   :  { %2148 = vmatpush3.bf16.msra.mxu1 %v2349_v31  ;;  %v1913_v38 = vpop.f32.mrf.mxu0  ;;  %v2712_v5 = vadd.f32 %v1971_v2, %v1970_v61  ;;  %v1957_v61 = vadd.f32 %v2676_v27, %v2673_v24  ;;  %v2371_v2 = vld [vmem:[#allocation9] sm:$0xff]   ;;  %v2373_v24 = vld [vmem:[#allocation12 + $0x38] sm:$0xff]  }
 0x14b   :  { %2149 = vmatprep.subr.bf16.mxu1 %v2549_v0  ;;  %v1973_v7 = vpop.f32.mrf.mxu1  ;;  %v1914_v10 = vadd.f32 %v1913_v38, %v1912_v35  ;;  %v2364_v38 = vld [vmem:[#allocation8 + $0x18] sm:$0xff]  }
 0x14c   :  { %2130 = vmatpush3.bf16.msra.mxu0 %v2350_v34  ;;  %v2691_v42 = vpop.f32.mrf.mxu0  ;;  %v1294_v11 = vpack.c.bf16 %v2712_v5, %v2708_v59  ;;  %v2363_v34 = vld [vmem:[#allocation9 + $0x20] sm:$0xff]  }
 0x14d   :  { %2131 = vmatprep.subr.bf16.mxu0 %v2549_v0  ;;  %v1974_v13 = vpop.f32.mrf.mxu1  ;;  %v835_v19 = vpack.c.bf16 %v1914_v10, %v1911_v9  ;;  %v2375_v9 = vld [vmem:[#allocation12 + $0x30] sm:$0xff]  }
 0x14e   :  { %2150 = vmatpush3.bf16.msra.mxu1 %v2351_v37  ;;  %v2694_v45 = vpop.f32.mrf.mxu0  ;;  %v2723_v15 = vadd.f32 %v1974_v13, %v1973_v7 }
 0x14f   :  { %2151 = vmatprep.subr.bf16.mxu1 %v2549_v0  ;;  %v1976_v17 = vpop.f32.mrf.mxu1  ;;  %v1917_v29 = vadd.f32 %v2694_v45, %v2691_v42 }
 0x150   :  { %2132 = vmatpush3.bf16.msra.mxu0 %v2352_v41  ;;  %v2699_v49 = vpop.f32.mrf.mxu0 }
 0x151   :  { %2133 = vmatprep.subr.bf16.mxu0 %v2549_v0  ;;  %v1977_v22 = vpop.f32.mrf.mxu1 }
 0x152   :  { %2152 = vmatpush3.bf16.msra.mxu1 %v2353_v44  ;;  %v1919_v55 = vpop.f32.mrf.mxu0  ;;  %v2729_v25 = vadd.f32 %v1977_v22, %v1976_v17  ;;  %v2378_v17 = vld [vmem:[#allocation11 + $0x20] sm:$0xff]   ;;  %v2382_v22 = vld [vmem:[#allocation11 + $0x10] sm:$0xff]  }
 0x153   :  { %2153 = vmatprep.subr.bf16.mxu1 %v2549_v0  ;;  %v1979_v26 = vpop.f32.mrf.mxu1  ;;  %v1920_v31 = vadd.f32 %v1919_v55, %v2699_v49 }
 0x154   :  { %2134 = vmatpush3.bf16.msra.mxu0 %v2354_v48  ;;  %v1921_v62 = vpop.f32.mrf.mxu0  ;;  %v1295_v32 = vpack.c.bf16 %v2729_v25, %v2723_v15  ;;  %v2366_v48 = vld [vmem:[#allocation8 + $0x10] sm:$0xff]  }
 0x155   :  { %2167 = vmatprep.subr.bf16.mxu0 %v2549_v0  ;;  %v1980_v35 = vpop.f32.mrf.mxu1  ;;  %v836_v42 = vpack.c.bf16 %v1920_v31, %v1917_v29  ;;  %v1960_v62 = vadd.f32 %v2684_v33, %v2681_v30  ;;  %v2374_v33 = vld [vmem:[#allocation11 + $0x30] sm:$0xff]   ;;  %v2387_v29 = vld [vmem:[#allocation12] sm:$0xff]  }
 0x156   :  { %2154 = vmatpush3.bf16.msra.mxu1 %v2355_v54  ;;  %v1922_v3 = vpop.f32.mrf.mxu0  ;;  %v2740_v37 = vadd.f32 %v1980_v35, %v1979_v26  ;;  %v2385_v26 = vld [vmem:[#allocation12 + $0x8] sm:$0xff]  }
 0x157   :  { %2136 = vmatmul.mubr.bf16.vlgmr.msra.gmra.mxu0 %v833_v63  ;;  %2187 = vmatprep.subr.bf16.mxu1 %v2549_v0  ;;  %v1982_v39 = vpop.f32.mrf.mxu1  ;;  %v2370_v63 = vld [vmem:[#allocation8] sm:$0xff]  }
 0x158   :  { %2168 = vmatpush3.bf16.msra.mxu0 %v2356_v60  ;;  %2183 = vmatprep.mubr.msk.bf16.mxu0 %vm2550_vm0, %v2549_v0  ;;  %v1924_v8 = vpop.f32.mrf.mxu0 }
 0x159   :  { %2156 = vmatmul.mubr.bf16.vlgmr.msra.gmra.mxu1 %v834_v4  ;;  %2169 = vmatprep.subr.bf16.mxu0 %v2549_v0  ;;  %v1983_v44 = vpop.f32.mrf.mxu1  ;;  %v1292_v4 = vpack.c.bf16 %v1960_v62, %v1957_v61 }
 0x15a   :  { %2188 = vmatpush3.bf16.msra.mxu1 %v2357_v1  ;;  %2159 = vmatprep.mubr.msk.bf16.mxu1 %vm2550_vm0, %v2549_v0  ;;  %v1925_v14 = vpop.f32.mrf.mxu0  ;;  %v2744_v46 = vadd.f32 %v1983_v44, %v1982_v39 }
 0x15b   :  { %2189 = vmatprep.subr.bf16.mxu1 %v2549_v0  ;;  %v2362_v0 = vld [vmem:[#allocation8 + $0x20] sm:$0xff]   ;;  %v1985_v49 = vpop.f32.mrf.mxu1  ;;  %v1420_v30 = vrot.slane %v1292_v4, 4  ;;  %v2377_v14 = vld [vmem:[#allocation12 + $0x28] sm:$0xff]  }
 0x15c   :  { %2170 = vmatpush3.bf16.msra.mxu0 %v2358_v6  ;;  %v1927_v18 = vpop.f32.mrf.mxu0  ;;  %v1296_v51 = vpack.c.bf16 %v2744_v46, %v2740_v37  ;;  %v2372_v6 = vld [vmem:[#allocation11 + $0x38] sm:$0xff]  }
 0x15d   :  { %2171 = vmatprep.subr.bf16.mxu0 %v2725_v20  ;;  %v1986_v54 = vpop.f32.mrf.mxu1  ;;  %v2379_v18 = vld [vmem:[#allocation12 + $0x20] sm:$0xff]  }
 0x15e   :  { %2190 = vmatpush3.bf16.msra.mxu1 %v2359_v12  ;;  %v1928_v23 = vpop.f32.mrf.mxu0  ;;  %v2376_v12 = vld [vmem:[#allocation11 + $0x28] sm:$0xff]  }
 0x15f   :  { %2191 = vmatprep.subr.bf16.mxu1 %v2725_v20  ;;  %v1988_v57 = vpop.f32.mrf.mxu1  ;;  %v2383_v23 = vld [vmem:[#allocation12 + $0x10] sm:$0xff]  }
 0x160   :  { %2172 = vmatpush3.bf16.msra.mxu0 %v2360_v16  ;;  %v1930_v28 = vpop.f32.mrf.mxu0 }
 0x161   :  { %2160 = vmatmul.mubr.bf16.gmra.mxu1 %v835_v19  ;;  %2173 = vmatprep.subr.bf16.mxu0 %v2725_v20  ;;  %v1989_v60 = vpop.f32.mrf.mxu1  ;;  %v2380_v19 = vld [vmem:[#allocation11 + $0x18] sm:$0xff]   ;;  %v2386_v28 = vld [vmem:[#allocation11] sm:$0xff]  }
 0x162   :  { %2192 = vmatpush3.bf16.msra.mxu1 %v2361_v21  ;;  %2163 = vmatprep.mubr.msk.bf16.mxu1 %vm2550_vm0, %v2725_v20  ;;  %v1931_v36 = vpop.f32.mrf.mxu0  ;;  %v2381_v21 = vld [vmem:[#allocation12 + $0x18] sm:$0xff]  }
 0x163   :  { %2193 = vmatprep.subr.bf16.mxu1 %v2725_v20  ;;  %v1991_v1 = vpop.f32.mrf.mxu1 }
 0x164   :  { %2174 = vmatpush3.bf16.msra.mxu0 %v2362_v0  ;;  %v1933_v41 = vpop.f32.mrf.mxu0  ;;  %v2384_v0 = vld [vmem:[#allocation11 + $0x8] sm:$0xff]  }
 0x165   :  { %2175 = vmatprep.subr.bf16.mxu0 %v2725_v20  ;;  %v1992_v3 = vpop.f32.mrf.mxu1 }
 0x166   :  { %2194 = vmatpush3.bf16.msra.mxu1 %v2363_v34  ;;  %v1934_v45 = vpop.f32.mrf.mxu0 }
 0x167   :  { %2195 = vmatprep.subr.bf16.mxu1 %v2725_v20  ;;  %v1994_v7 = vpop.f32.mrf.mxu1 }
 0x168   :  { %2176 = vmatpush3.bf16.msra.mxu0 %v2364_v38  ;;  %v1936_v50 = vpop.f32.mrf.mxu0 }
 0x169   :  { %2164 = vmatmul.mubr.bf16.gmra.mxu1 %v836_v42  ;;  %2177 = vmatprep.subr.bf16.mxu0 %v2725_v20  ;;  %v1995_v27 = vpop.f32.mrf.mxu1 }
 0x16a   :  { %2196 = vmatpush3.bf16.msra.mxu1 %v2365_v43  ;;  %2203 = vmatprep.mubr.msk.bf16.mxu1 %vm2550_vm0, %v2725_v20  ;;  %v1937_v55 = vpop.f32.mrf.mxu0 }
 0x16b   :  { %2197 = vmatprep.subr.bf16.mxu1 %v2725_v20  ;;  %v1997_v8 = vpop.f32.mrf.mxu1 }
 0x16c   :  { %2178 = vmatpush3.bf16.msra.mxu0 %v2366_v48 }
 0x16d   :  { %2179 = vmatprep.subr.bf16.mxu0 %v2725_v20  ;;  %v1998_v10 = vpop.f32.mrf.mxu1 }
 0x16e   :  { %2198 = vmatpush3.bf16.msra.mxu1 %v2367_v52 }
 0x16f   :  { %2199 = vmatprep.subr.bf16.mxu1 %v2725_v20  ;;  %v2000_v13 = vpop.f32.mrf.mxu1 }
 0x170   :  { %2180 = vmatpush3.bf16.msra.mxu0 %v2368_v56 }
 0x171   :  { %2181 = vmatprep.subr.bf16.mxu0 %v2725_v20  ;;  %v2001_v16 = vpop.f32.mrf.mxu1 }
 0x172   :  { %2200 = vmatpush3.bf16.msra.mxu1 %v2369_v58 }
 0x173   :  { %2201 = vmatprep.subr.bf16.mxu1 %v2725_v20 }
 0x174   :  { %2182 = vmatpush3.bf16.msra.mxu0 %v2370_v63 }
 0x175   :  { %2207 = vmatprep.subr.bf16.mxu0 %v2725_v20 }
 0x176   :  { %2202 = vmatpush3.bf16.msra.mxu1 %v2371_v2 }
 0x177   :  { %2184 = vmatmul.mubr.bf16.vlgmr.msra.gmra.mxu0 %v1292_v4  ;;  %2227 = vmatprep.subr.bf16.mxu1 %v2725_v20 }
 0x178   :  { %2208 = vmatpush3.bf16.msra.mxu0 %v2372_v6  ;;  %2223 = vmatprep.mubr.msk.bf16.mxu0 %vm2550_vm0, %v2725_v20 }
 0x179   :  { %2204 = vmatmul.mubr.bf16.vlgmr.msra.gmra.mxu1 %v1420_v30  ;;  %2209 = vmatprep.subr.bf16.mxu0 %v2725_v20 }
 0x17a   :  { %2228 = vmatpush3.bf16.msra.mxu1 %v2373_v24  ;;  %2243 = vmatprep.mubr.msk.bf16.mxu1 %vm2550_vm0, %v2725_v20 }
 0x17b   :  { %2229 = vmatprep.subr.bf16.mxu1 %v2725_v20 }
 0x17c   :  { %2210 = vmatpush3.bf16.msra.mxu0 %v2374_v33 }
 0x17d   :  { %2211 = vmatprep.subr.bf16.mxu0 %v2725_v20 }
 0x17e   :  { %2230 = vmatpush3.bf16.msra.mxu1 %v2375_v9 }
 0x17f   :  { %2231 = vmatprep.subr.bf16.mxu1 %v2725_v20 }
 0x180   :  { %2212 = vmatpush3.bf16.msra.mxu0 %v2376_v12 }
 0x181   :  { %2213 = vmatprep.subr.bf16.mxu0 %v2725_v20 }
 0x182   :  { %2232 = vmatpush3.bf16.msra.mxu1 %v2377_v14 }
 0x183   :  { %2233 = vmatprep.subr.bf16.mxu1 %v2725_v20 }
 0x184   :  { %2214 = vmatpush3.bf16.msra.mxu0 %v2378_v17 }
 0x185   :  { %2215 = vmatprep.subr.bf16.mxu0 %v2725_v20 }
 0x186   :  { %2234 = vmatpush3.bf16.msra.mxu1 %v2379_v18 }
 0x187   :  { %2235 = vmatprep.subr.bf16.mxu1 %v2725_v20 }
 0x188   :  { %2216 = vmatpush3.bf16.msra.mxu0 %v2380_v19 }
 0x189   :  { %2217 = vmatprep.subr.bf16.mxu0 %v2725_v20 }
 0x18a   :  { %2236 = vmatpush3.bf16.msra.mxu1 %v2381_v21 }
 0x18b   :  { %2237 = vmatprep.subr.bf16.mxu1 %v2725_v20 }
 0x18c   :  { %2218 = vmatpush3.bf16.msra.mxu0 %v2382_v22 }
 0x18d   :  { %2219 = vmatprep.subr.bf16.mxu0 %v2725_v20 }
 0x18e   :  { %2238 = vmatpush3.bf16.msra.mxu1 %v2383_v23 }
 0x18f   :  { %2239 = vmatprep.subr.bf16.mxu1 %v2725_v20 }
 0x190   :  { %2220 = vmatpush3.bf16.msra.mxu0 %v2384_v0 }
 0x191   :  { %2221 = vmatprep.subr.bf16.mxu0 %v2725_v20 }
 0x192   :  { %2240 = vmatpush3.bf16.msra.mxu1 %v2385_v26 }
 0x193   :  { %2241 = vmatprep.subr.bf16.mxu1 %v2725_v20 }
 0x194   :  { %2222 = vmatpush3.bf16.msra.mxu0 %v2386_v28 }
 0x196   :  { %2242 = vmatpush3.bf16.msra.mxu1 %v2387_v29 }
 0x197   :  { %2224 = vmatmul.mubr.bf16.vlgmr.msra.gmra.mxu0 %v1293_v53 }
 0x199   :  { %2244 = vmatmul.mubr.bf16.vlgmr.msra.gmra.mxu1 %v1294_v11 }
 0x19a   :  { %2247 = vmatprep.mubr.msk.bf16.mxu1 %vm2550_vm0, %v2725_v20 }
 0x1a1   :  { %2248 = vmatmul.mubr.bf16.gmra.mxu1 %v1295_v32 }
 0x1a2   :  { %2251 = vmatprep.mubr.msk.bf16.mxu1 %vm2550_vm0, %v2725_v20 }
 0x1a9   :  { %2252 = vmatmul.mubr.bf16.gmra.mxu1 %v1296_v51 }
 0x1f7   :  { %v935_v40 = vpop.f32.mrf.mxu0 }
 0x1f8   :  { %941 = vst [vmem:[#allocation14] sm:$0xff] %v935_v40 }
 0x1f9   :  { %v2097_v47 = vpop.f32.mrf.mxu0  ;;  %v1043_v53 = vpop.f32.mrf.mxu1 }
 0x1fa   :  { %1049 = vst [vmem:[#allocation14 + $0x8] sm:$0xff] %v1043_v53 }
 0x1fb   :  { %v938_v59 = vpop.f32.mrf.mxu0  ;;  %v2117_v5 = vpop.f32.mrf.mxu1 }
 0x1fd   :  { %v2098_v11 = vpop.f32.mrf.mxu0  ;;  %v1046_v31 = vpop.f32.mrf.mxu1 }
 0x1ff   :  { %v2118_v34 = vpop.f32.mrf.mxu1 }
 0x217   :  { %v1148_v35 = vpop.f32.mrf.mxu0 }
 0x218   :  { %1155 = vst [vmem:[#allocation14 + $0x10] sm:$0xff] %v1148_v35 }
 0x219   :  { %v2137_v15 = vpop.f32.mrf.mxu0  ;;  %v1255_v25 = vpop.f32.mrf.mxu1 }
 0x21a   :  { %1277 = vst [vmem:[#allocation14 + $0x20] sm:$0xff] %v1255_v25 }
 0x21b   :  { %v1151_v20 = vpop.f32.mrf.mxu0  ;;  %v2157_v32 = vpop.f32.mrf.mxu1 }
 0x21c   :  { %1156 = vst [vmem:[#allocation14 + $0x18] sm:$0xff] %v1151_v20 }
 0x21d   :  { %v2138_v36 = vpop.f32.mrf.mxu0  ;;  %v1258_v37 = vpop.f32.mrf.mxu1 }
 0x21e   :  { %1278 = vst [vmem:[#allocation14 + $0x28] sm:$0xff] %v1258_v37 }
 0x21f   :  { %v2158_v38 = vpop.f32.mrf.mxu1 }
 0x221   :  { %v1263_v39 = vpop.f32.mrf.mxu1 }
 0x222   :  { %1279 = vst [vmem:[#allocation14 + $0x30] sm:$0xff] %v1263_v39 }
 0x223   :  { %v2161_v41 = vpop.f32.mrf.mxu1 }
 0x225   :  { %v1266_v42 = vpop.f32.mrf.mxu1 }
 0x226   :  { %1280 = vst [vmem:[#allocation14 + $0x38] sm:$0xff] %v1266_v42 }
 0x227   :  { %v2162_v43 = vpop.f32.mrf.mxu1 }
 0x229   :  { %v1271_v44 = vpop.f32.mrf.mxu1 }
 0x22a   :  { %1281 = vst [vmem:[#allocation14 + $0x40] sm:$0xff] %v1271_v44 }
 0x22b   :  { %v2165_v45 = vpop.f32.mrf.mxu1 }
 0x22d   :  { %v1274_v46 = vpop.f32.mrf.mxu1 }
 0x22f   :  { %v2166_v48 = vpop.f32.mrf.mxu1 }
 0x237   :  { %v1395_v49 = vpop.f32.mrf.mxu0 }
 0x238   :  { %1402 = vst [vmem:[#allocation14 + $0x80] sm:$0xff] %v1395_v49 }
 0x239   :  { %v2185_v50 = vpop.f32.mrf.mxu0  ;;  %v1504_v51 = vpop.f32.mrf.mxu1 }
 0x23a   :  { %1510 = vst [vmem:[#allocation14 + $0x88] sm:$0xff] %v1504_v51 }
 0x23b   :  { %v1398_v52 = vpop.f32.mrf.mxu0  ;;  %v2205_v54 = vpop.f32.mrf.mxu1 }
 0x23d   :  { %v2186_v55 = vpop.f32.mrf.mxu0  ;;  %v1507_v56 = vpop.f32.mrf.mxu1 }
 0x23f   :  { %v2206_v57 = vpop.f32.mrf.mxu1 }
 0x257   :  { %v1609_v58 = vpop.f32.mrf.mxu0 }
 0x258   :  { %1616 = vst [vmem:[#allocation14 + $0x90] sm:$0xff] %v1609_v58 }
 0x259   :  { %v2225_v60 = vpop.f32.mrf.mxu0  ;;  %v1716_v61 = vpop.f32.mrf.mxu1 }
 0x25a   :  { %1738 = vst [vmem:[#allocation14 + $0xa0] sm:$0xff] %v1716_v61 }
 0x25b   :  { %v1612_v62 = vpop.f32.mrf.mxu0  ;;  %v2245_v63 = vpop.f32.mrf.mxu1 }
 0x25c   :  { %1617 = vst [vmem:[#allocation14 + $0x98] sm:$0xff] %v1612_v62 }
 0x25d   :  { %v2226_v1 = vpop.f32.mrf.mxu0  ;;  %v1719_v2 = vpop.f32.mrf.mxu1 }
 0x25e   :  { %1739 = vst [vmem:[#allocation14 + $0xa8] sm:$0xff] %v1719_v2 }
 0x25f   :  { %v2246_v3 = vpop.f32.mrf.mxu1 }
 0x261   :  { %v1724_v4 = vpop.f32.mrf.mxu1 }
 0x262   :  { %1740 = vst [vmem:[#allocation14 + $0xb0] sm:$0xff] %v1724_v4 }
 0x263   :  { %v2249_v6 = vpop.f32.mrf.mxu1 }
 0x265   :  { %v1727_v7 = vpop.f32.mrf.mxu1 }
 0x266   :  { %1741 = vst [vmem:[#allocation14 + $0xb8] sm:$0xff] %v1727_v7 }
 0x267   :  { %v2250_v24 = vpop.f32.mrf.mxu1 }
 0x269   :  { %v1732_v27 = vpop.f32.mrf.mxu1 }
 0x26a   :  { %1742 = vst [vmem:[#allocation14 + $0xc0] sm:$0xff] %v1732_v27 }
 0x26b   :  { %v2253_v30 = vpop.f32.mrf.mxu1 }
 0x26c   :  { %2520 = shalt.err (!%p2517_p6)
}
 0x26d   :  { %1754 = dma.vmem_to_hbm [thread:$0]  %s1749_s5, 4096, %s2808_s6, [#allocation5], %s2540_s24, %s2540_s24, %s2541_s25   ;;  %v1735_v33 = vpop.f32.mrf.mxu1 }
 0x26f   :  { %v2254_v8 = vpop.f32.mrf.mxu1 }
 0x270   :  { %2537 = dma.done.wait [#allocation5], 4096  }
 0x271   :  { %2538 = vsyncadd [#allocation5], 4294963200 }
 0x272   :  { %1758 = vsyncpa [#allocation4], 1 }
 0x273   :  { %1759 = vsyncpa [#allocation7], 1 }
 0x274   :  { %1760 = vsyncpa [#allocation10], 1 }
 0x275   :  { %1761 = vsyncpa [#allocation13], 1 }
 0x276   :  { %1762 = vsyncpa [#allocation5], 1 }

// kernel: tpu_custom_call.1
= control target key start
LH: loop header
LB: loop body
LE: loop exit
PB: predicated region body
PF: predicated region fallthrough
CT: control target
= control target key end

     0   :  { %11 = vsyncpa [#allocation4], 0  ;;  %s2802_s0 = inlined_call_operand.hbm [shape: bf16[2,256,128], index: 0, kind: input, shape index: {}]   ;;  %s2803_s1 = inlined_call_operand.hbm [shape: bf16[128,256], index: 1, kind: input, shape index: {}]   ;;  %s2804_s2 = inlined_call_operand.hbm [shape: bf16[128,128], index: 2, kind: input, shape index: {}]   ;;  %s2805_s3 = inlined_call_operand.hbm [shape: bf16[128,128], index: 3, kind: input, shape index: {}]   ;;  %s2806_s4 = inlined_call_operand.hbm [shape: bf16[128,128], index: 4, kind: input, shape index: {}]   ;;  %s2807_s5 = inlined_call_operand.hbm [shape: bf16[128,128], index: 5, kind: input, shape index: {}]   ;;  %s2808_s6 = inlined_call_operand.hbm [shape: f32[2,128,128], index: 6, kind: output, shape index: {}]  }
   0x1   :  { %12 = vsyncpa [#allocation7], 0 }
   0x2   :  { %13 = vsyncpa [#allocation10], 0 }
   0x3   :  { %14 = vsyncpa [#allocation13], 0 }
   0x4   :  { %15 = vsyncpa [#allocation5], 0  ;;  %s2539_s21 = smov [#allocation6]  }
   0x5   :  { %s33_s22 = sshll.u32 %s2539_s21, 4  ;;  %s34_s22 = int_to_ptr.vmem [resolvable:$true] %s33_s22 }
   0x6   :  { %s2397_s23 = scalar_lea.vmem %s34_s22, 2048  ;;  %p2402_p1 = scmp.lt.s32.totalorder %s34_s22, %s34_s22 }
   0x7   :  { %p2398_p0 = scmp.ne.s32.totalorder %s34_s22, %s2397_s23  ;;  %p2403_p2 = scmp.lt.s32.totalorder %s2397_s23, %s2397_s23 }
   0x9   :  { %p2404_p3 = por %p2403_p2, %p2402_p1 }
   0xb   :  { %p2405_p4 = pnand %p2404_p3, %p2398_p0 }
   0xd   :  { %2408 = shalt.err (!%p2405_p4)
}
   0xe   :  { %s2540_s24 = smov 128   ;;  %s2541_s25 = smov 8  }
   0xf   :  { %39 = dma.hbm_to_vmem [thread:$0]  %s2803_s1, 2048, %s34_s22, [#allocation7], %s2540_s24, %s2540_s24, %s2541_s25  }
  0x10   :  { %s2542_s28 = smov [#allocation9]   ;;  %s2543_s30 = smov [#allocation3]  }
  0x11   :  { %s57_s29 = sshll.u32 %s2542_s28, 4  ;;  %s21_s7 = sshll.u32 %s2543_s30, 4  ;;  %s58_s29 = int_to_ptr.vmem [resolvable:$true] %s57_s29  ;;  %s22_s7 = int_to_ptr.vmem [resolvable:$true] %s21_s7 }
  0x12   :  { %s2417_s8 = scalar_lea.vmem %s58_s29, 1024  ;;  %p2422_p6 = scmp.lt.s32.totalorder %s58_s29, %s58_s29 }
  0x13   :  { %p2418_p5 = scmp.ne.s32.totalorder %s58_s29, %s2417_s8  ;;  %p2423_p7 = scmp.lt.s32.totalorder %s2417_s8, %s2417_s8 }
  0x15   :  { %p2424_p8 = por %p2423_p7, %p2422_p6 }
  0x17   :  { %p2425_p9 = pnand %p2424_p8, %p2418_p5 }
  0x19   :  { %2428 = shalt.err (!%p2425_p9)
}
  0x1a   :  { %s2544_s9 = smov 64   ;;  %s2545_s10 = smov 4  }
  0x1b   :  { %63 = dma.hbm_to_vmem [thread:$0]  %s2805_s3, 1024, %s58_s29, [#allocation10], %s2544_s9, %s2544_s9, %s2545_s10  }
  0x1c   :  { %s2437_s1 = scalar_lea.vmem %s22_s7, 4096  ;;  %p2442_p11 = scmp.lt.s32.totalorder %s22_s7, %s22_s7 }
  0x1d   :  { %p2438_p10 = scmp.ne.s32.totalorder %s22_s7, %s2437_s1  ;;  %p2443_p12 = scmp.lt.s32.totalorder %s2437_s1, %s2437_s1 }
  0x1f   :  { %p2444_p13 = por %p2443_p12, %p2442_p11 }
  0x21   :  { %p2445_p0 = pnand %p2444_p13, %p2438_p10 }
  0x23   :  { %2448 = shalt.err (!%p2445_p0)
}
  0x24   :  { %27 = dma.hbm_to_vmem [thread:$0]  %s2802_s0, 4096, %s22_s7, [#allocation4], %s2544_s9, %s2544_s9, %s2545_s10  }
  0x25   :  { %s2546_s15 = smov [#allocation8]   ;;  %s2547_s17 = smov [#allocation11]  }
  0x26   :  { %s45_s16 = sshll.u32 %s2546_s15, 4  ;;  %s69_s3 = sshll.u32 %s2547_s17, 4  ;;  %s46_s16 = int_to_ptr.vmem [resolvable:$true] %s45_s16  ;;  %s70_s3 = int_to_ptr.vmem [resolvable:$true] %s69_s3 }
  0x27   :  { %s2457_s18 = scalar_lea.vmem %s46_s16, 1024  ;;  %p2462_p2 = scmp.lt.s32.totalorder %s46_s16, %s46_s16 }
  0x28   :  { %p2458_p1 = scmp.ne.s32.totalorder %s46_s16, %s2457_s18  ;;  %p2463_p3 = scmp.lt.s32.totalorder %s2457_s18, %s2457_s18 }
  0x2a   :  { %p2464_p4 = por %p2463_p3, %p2462_p2 }
  0x2c   :  { %p2465_p5 = pnand %p2464_p4, %p2458_p1 }
  0x2e   :  { %2468 = shalt.err (!%p2465_p5)
}
  0x2f   :  { %51 = dma.hbm_to_vmem [thread:$0]  %s2804_s2, 1024, %s46_s16, [#allocation7], %s2544_s9, %s2544_s9, %s2545_s10  }
  0x30   :  { %s2477_s0 = scalar_lea.vmem %s70_s3, 1024  ;;  %p2482_p7 = scmp.lt.s32.totalorder %s70_s3, %s70_s3 }
  0x31   :  { %p2478_p6 = scmp.ne.s32.totalorder %s70_s3, %s2477_s0  ;;  %p2483_p8 = scmp.lt.s32.totalorder %s2477_s0, %s2477_s0 }
  0x33   :  { %p2484_p9 = por %p2483_p8, %p2482_p7 }
  0x35   :  { %p2485_p10 = pnand %p2484_p9, %p2478_p6 }
  0x37   :  { %2488 = shalt.err (!%p2485_p10)
}
  0x38   :  { %75 = dma.hbm_to_vmem [thread:$0]  %s2806_s4, 1024, %s70_s3, [#allocation10], %s2544_s9, %s2544_s9, %s2545_s10  }
  0x39   :  { %s2548_s23 = smov [#allocation12]  }
  0x3a   :  { %s81_s26 = sshll.u32 %s2548_s23, 4  ;;  %s82_s26 = int_to_ptr.vmem [resolvable:$true] %s81_s26 }
  0x3b   :  { %s2497_s27 = scalar_lea.vmem %s82_s26, 1024  ;;  %p2502_p12 = scmp.lt.s32.totalorder %s82_s26, %s82_s26 }
  0x3c   :  { %p2498_p11 = scmp.ne.s32.totalorder %s82_s26, %s2497_s27  ;;  %p2503_p13 = scmp.lt.s32.totalorder %s2497_s27, %s2497_s27 }
  0x3e   :  { %p2504_p0 = por %p2503_p13, %p2502_p12 }
  0x40   :  { %p2505_p1 = pnand %p2504_p0, %p2498_p11 }
  0x42   :  { %2508 = shalt.err (!%p2505_p1)
}
  0x43   :  { %87 = dma.hbm_to_vmem [thread:$0]  %s2807_s5, 1024, %s82_s26, [#allocation13], %s2544_s9, %s2544_s9, %s2545_s10  }
  0x44   :  { %2529 = dma.done.wait [#allocation4], 4096  }
  0x45   :  { %2530 = vsyncadd [#allocation4], 4294963200 }
  0x46   :  { %2531 = dma.done.wait [#allocation7], 3072  }
  0x47   :  { %2532 = vsyncadd [#allocation7], 4294964224 }
  0x48   :  { %2533 = dma.done.wait [#allocation10], 2048  }
  0x49   :  { %2534 = vsyncadd [#allocation10], 4294965248 }
  0x4a   :  { %2535 = dma.done.wait [#allocation13], 1024  }
  0x4b   :  { %2536 = vsyncadd [#allocation13], 4294966272  ;;  %v2549_v0 = vmov 0.0   ;;  %v2268_v1 = vld [vmem:[#allocation3 + $0x78] sm:$0xff]   ;;  %v2270_v3 = vld [vmem:[#allocation3 + $0x70] sm:$0xff]   ;;  %vm2550_vm0 = vmmov 0  }
  0x4c   :  { %799 = vst [vmem:[#allocation14 + $0x48] sm:$0xff] %v2549_v0  ;;  %800 = vst [vmem:[#allocation14 + $0x50] sm:$0xff] %v2549_v0  ;;  %v2269_v2 = vld [vmem:[#allocation3 + $0x38] sm:$0xff]   ;;  %1875 = vmatprep.subr.bf16.mxu0 %v2268_v1  ;;  %v2271_v4 = vld [vmem:[#allocation3 + $0x30] sm:$0xff]   ;;  %s2551_s4 = smov [#allocation14]  }
  0x4d   :  { %801 = vst [vmem:[#allocation14 + $0x58] sm:$0xff] %v2549_v0  ;;  %802 = vst [vmem:[#allocation14 + $0x60] sm:$0xff] %v2549_v0  ;;  %1876 = vmatpush3.bf16.msra.mxu0 %v2269_v2  ;;  %v2272_v5 = vld [vmem:[#allocation3 + $0x68] sm:$0xff]   ;;  %v2274_v7 = vld [vmem:[#allocation3 + $0x60] sm:$0xff]   ;;  %s1748_s5 = sshll.u32 %s2551_s4, 4  ;;  %s1749_s5 = int_to_ptr.vmem [resolvable:$true] %s1748_s5 }
  0x4e   :  { %803 = vst [vmem:[#allocation14 + $0x68] sm:$0xff] %v2549_v0  ;;  %804 = vst [vmem:[#allocation14 + $0x70] sm:$0xff] %v2549_v0  ;;  %1877 = vmatprep.subr.bf16.mxu0 %v2270_v3  ;;  %v2273_v6 = vld [vmem:[#allocation3 + $0x28] sm:$0xff]   ;;  %v2275_v8 = vld [vmem:[#allocation3 + $0x20] sm:$0xff]   ;;  %s2509_s29 = scalar_lea.vmem %s1749_s5, 4096  ;;  %p2514_p3 = scmp.lt.s32.totalorder %s1749_s5, %s1749_s5 }
  0x4f   :  { %805 = vst [vmem:[#allocation14 + $0x78] sm:$0xff] %v2549_v0  ;;  %815 = vst [vmem:[#allocation14 + $0xc8] sm:$0xff] %v2549_v0  ;;  %v2276_v9 = vld [vmem:[#allocation3 + $0x58] sm:$0xff]   ;;  %v2278_v11 = vld [vmem:[#allocation3 + $0x50] sm:$0xff]   ;;  %p2510_p2 = scmp.ne.s32.totalorder %s1749_s5, %s2509_s29  ;;  %p2515_p4 = scmp.lt.s32.totalorder %s2509_s29, %s2509_s29 }
  0x50   :  { %816 = vst [vmem:[#allocation14 + $0xd0] sm:$0xff] %v2549_v0  ;;  %817 = vst [vmem:[#allocation14 + $0xd8] sm:$0xff] %v2549_v0  ;;  %v2277_v10 = vld [vmem:[#allocation3 + $0x18] sm:$0xff]   ;;  %v2286_v12 = vld [vmem:[#allocation6 + $0x4] ss:$8 sps:$4 sm:$0xff]  }
  0x51   :  { %818 = vst [vmem:[#allocation14 + $0xe0] sm:$0xff] %v2549_v0  ;;  %819 = vst [vmem:[#allocation14 + $0xe8] sm:$0xff] %v2549_v0  ;;  %1878 = vmatpush3.bf16.msra.mxu0 %v2271_v4  ;;  %v2279_v13 = vld [vmem:[#allocation3 + $0x10] sm:$0xff]   ;;  %415 = vmatprep.mubr.bf16.mxu0 %v2286_v12  ;;  %v2290_v14 = vld [vmem:[#allocation3 + $0xf8] sm:$0xff]   ;;  %p2516_p5 = por %p2515_p4, %p2514_p3 }
  0x52   :  { %820 = vst [vmem:[#allocation14 + $0xf0] sm:$0xff] %v2549_v0  ;;  %821 = vst [vmem:[#allocation14 + $0xf8] sm:$0xff] %v2549_v0  ;;  %1879 = vmatprep.subr.bf16.mxu0 %v2272_v5  ;;  %v2280_v15 = vld [vmem:[#allocation3 + $0x48] sm:$0xff]   ;;  %690 = vmatprep.mubr.bf16.mxu1 %v2286_v12  ;;  %v2293_v17 = vld [vmem:[#allocation3 + $0xb8] sm:$0xff]  }
  0x53   :  { %v2281_v16 = vld [vmem:[#allocation3 + $0x8] sm:$0xff]   ;;  %1939 = vmatprep.subr.bf16.mxu1 %v2290_v14  ;;  %v2282_v18 = vld [vmem:[#allocation3 + $0x40] sm:$0xff]   ;;  %v2295_v19 = vld [vmem:[#allocation3 + $0xf0] sm:$0xff]   ;;  %p2517_p6 = pnand %p2516_p5, %p2510_p2 }
  0x54   :  { %1940 = vmatpush3.bf16.msra.mxu1 %v2293_v17  ;;  %v2296_v20 = vld [vmem:[#allocation3 + $0xb0] sm:$0xff]   ;;  %v2297_v21 = vld [vmem:[#allocation3 + $0xe8] sm:$0xff]   ;;  %v2283_v22 = vld [vmem:[#allocation3] sm:$0xff]  }
  0x55   :  { %1880 = vmatpush3.bf16.msra.mxu0 %v2273_v6  ;;  %1941 = vmatprep.subr.bf16.mxu1 %v2295_v19  ;;  %v2298_v23 = vld [vmem:[#allocation3 + $0xa8] sm:$0xff]   ;;  %v2299_v24 = vld [vmem:[#allocation3 + $0xe0] sm:$0xff]   ;;  %v2287_v26 = vld [vmem:[#allocation6 + $0x14] ss:$8 sps:$4 sm:$0xff]  }
  0x56   :  { %1881 = vmatprep.subr.bf16.mxu0 %v2274_v7  ;;  %v2284_v25 = vld [vmem:[#allocation6] ss:$8 sps:$4 sm:$0xff]   ;;  %v2304_v28 = vld [vmem:[#allocation3 + $0xd8] sm:$0xff]   ;;  %v2306_v30 = vld [vmem:[#allocation3 + $0xd0] sm:$0xff]  }
  0x57   :  { %v2300_v27 = vld [vmem:[#allocation3 + $0xa0] sm:$0xff]   ;;  %v2305_v29 = vld [vmem:[#allocation3 + $0x98] sm:$0xff]   ;;  %v2307_v33 = vld [vmem:[#allocation3 + $0x90] sm:$0xff]  }
  0x58   :  { %1942 = vmatpush3.bf16.msra.mxu1 %v2296_v20  ;;  %v2289_v31 = vld [vmem:[#allocation6 + $0x10] ss:$8 sps:$4 sm:$0xff]   ;;  %v2291_v32 = vld [vmem:[#allocation6 + $0x24] ss:$8 sps:$4 sm:$0xff]   ;;  %v2294_v39 = vld [vmem:[#allocation6 + $0x20] ss:$8 sps:$4 sm:$0xff]  }
  0x59   :  { %1882 = vmatpush3.bf16.msra.mxu0 %v2275_v8  ;;  %1943 = vmatprep.subr.bf16.mxu1 %v2297_v21  ;;  %v2311_v34 = vld [vmem:[#allocation3 + $0xc8] sm:$0xff]   ;;  %v2317_v35 = vld [vmem:[#allocation8 + $0x38] sm:$0xff]   ;;  %v2313_v37 = vld [vmem:[#allocation3 + $0xc0] sm:$0xff]  }
  0x5a   :  { %1883 = vmatprep.subr.bf16.mxu0 %v2276_v9  ;;  %v2312_v36 = vld [vmem:[#allocation3 + $0x88] sm:$0xff]   ;;  %v2319_v38 = vld [vmem:[#allocation8 + $0x30] sm:$0xff]   ;;  %v2314_v41 = vld [vmem:[#allocation3 + $0x80] sm:$0xff]  }
  0x5b   :  { %v2301_v40 = vld [vmem:[#allocation6 + $0x34] ss:$8 sps:$4 sm:$0xff]   ;;  %v2321_v42 = vld [vmem:[#allocation8 + $0x28] sm:$0xff]   ;;  %v2326_v44 = vld [vmem:[#allocation8 + $0x20] sm:$0xff]  }
  0x5c   :  { %1944 = vmatpush3.bf16.msra.mxu1 %v2298_v23  ;;  %v2315_v43 = vld [vmem:[#allocation9 + $0x38] sm:$0xff]   ;;  %v2308_v46 = vld [vmem:[#allocation6 + $0x44] ss:$8 sps:$4 sm:$0xff]   ;;  %v2316_v47 = vld [vmem:[#allocation9 + $0x30] sm:$0xff]  }
  0x5d   :  { %1884 = vmatpush3.bf16.msra.mxu0 %v2277_v10  ;;  %1945 = vmatprep.subr.bf16.mxu1 %v2299_v24  ;;  %v2303_v45 = vld [vmem:[#allocation6 + $0x30] ss:$8 sps:$4 sm:$0xff]   ;;  %v2318_v49 = vld [vmem:[#allocation9 + $0x28] sm:$0xff]   ;;  %v2320_v52 = vld [vmem:[#allocation9 + $0x20] sm:$0xff]  }
  0x5e   :  { %1885 = vmatprep.subr.bf16.mxu0 %v2278_v11  ;;  %v2331_v48 = vld [vmem:[#allocation8 + $0x18] sm:$0xff]   ;;  %v2336_v50 = vld [vmem:[#allocation8 + $0x10] sm:$0xff]   ;;  %v2310_v51 = vld [vmem:[#allocation6 + $0x40] ss:$8 sps:$4 sm:$0xff]  }
  0x5f   :  { %v2323_v53 = vld [vmem:[#allocation6 + $0x54] ss:$8 sps:$4 sm:$0xff]   ;;  %v2325_v56 = vld [vmem:[#allocation6 + $0x50] ss:$8 sps:$4 sm:$0xff]   ;;  %v2328_v57 = vld [vmem:[#allocation6 + $0x64] ss:$8 sps:$4 sm:$0xff]  }
  0x60   :  { %1946 = vmatpush3.bf16.msra.mxu1 %v2300_v27  ;;  %v2322_v54 = vld [vmem:[#allocation9 + $0x18] sm:$0xff]   ;;  %v2327_v55 = vld [vmem:[#allocation9 + $0x10] sm:$0xff]   ;;  %v2332_v58 = vld [vmem:[#allocation9 + $0x8] sm:$0xff]  }
  0x61   :  { %1886 = vmatpush3.bf16.msra.mxu0 %v2279_v13  ;;  %1947 = vmatprep.subr.bf16.mxu1 %v2304_v28  ;;  %v2330_v59 = vld [vmem:[#allocation6 + $0x60] ss:$8 sps:$4 sm:$0xff]   ;;  %v2333_v60 = vld [vmem:[#allocation6 + $0x74] ss:$8 sps:$4 sm:$0xff]   ;;  %v2335_v61 = vld [vmem:[#allocation6 + $0x70] ss:$8 sps:$4 sm:$0xff]  }
  0x62   :  { %1887 = vmatprep.subr.bf16.mxu0 %v2280_v15  ;;  %v2337_v62 = vld [vmem:[#allocation8 + $0x8] sm:$0xff]   ;;  %v2338_v63 = vld [vmem:[#allocation9] sm:$0xff]   ;;  %v2340_v8 = vld [vmem:[#allocation11 + $0x38] sm:$0xff]  }
  0x63   :  { %v2339_v1 = vld [vmem:[#allocation8] sm:$0xff]   ;;  %v2341_v11 = vld [vmem:[#allocation12 + $0x38] sm:$0xff]   ;;  %v2342_v14 = vld [vmem:[#allocation11 + $0x30] sm:$0xff]  }
  0x64   :  { %1948 = vmatpush3.bf16.msra.mxu1 %v2305_v29  ;;  %v2345_v20 = vld [vmem:[#allocation12 + $0x28] sm:$0xff]   ;;  %v2348_v28 = vld [vmem:[#allocation11 + $0x18] sm:$0xff]  }
  0x65   :  { %1888 = vmatpush3.bf16.msra.mxu0 %v2281_v16  ;;  %1949 = vmatprep.subr.bf16.mxu1 %v2306_v30  ;;  %v2343_v16 = vld [vmem:[#allocation12 + $0x30] sm:$0xff]  }
  0x66   :  { %1889 = vmatprep.subr.bf16.mxu0 %v2282_v18  ;;  %v2344_v18 = vld [vmem:[#allocation11 + $0x28] sm:$0xff]  }
  0x68   :  { %1950 = vmatpush3.bf16.msra.mxu1 %v2307_v33 }
  0x69   :  { %1890 = vmatpush3.bf16.msra.mxu0 %v2283_v22  ;;  %1951 = vmatprep.subr.bf16.mxu1 %v2311_v34  ;;  %v2346_v22 = vld [vmem:[#allocation11 + $0x20] sm:$0xff]   ;;  %v2350_v34 = vld [vmem:[#allocation11 + $0x10] sm:$0xff]  }
  0x6a   :  { %2079 = vmatprep.subr.bf16.mxu0 %v2549_v0 }
  0x6c   :  { %416 = vmatmul.mubr.bf16.vlgmr.msra.gmra.mxu0 %v2284_v25  ;;  %1952 = vmatpush3.bf16.msra.mxu1 %v2312_v36 }
  0x6d   :  { %423 = vmatprep.mubr.bf16.mxu0 %v2287_v26  ;;  %2080 = vmatpush3.bf16.msra.mxu0 %v2317_v35 }
  0x6e   :  { %2081 = vmatprep.subr.bf16.mxu0 %v2549_v0  ;;  %1953 = vmatprep.subr.bf16.mxu1 %v2313_v37  ;;  %v2351_v37 = vld [vmem:[#allocation12 + $0x10] sm:$0xff]  }
  0x70   :  { %1954 = vmatpush3.bf16.msra.mxu1 %v2314_v41  ;;  %v2352_v41 = vld [vmem:[#allocation11 + $0x8] sm:$0xff]  }
  0x71   :  { %2082 = vmatpush3.bf16.msra.mxu0 %v2319_v38  ;;  %2099 = vmatprep.subr.bf16.mxu1 %v2549_v0 }
  0x72   :  { %2083 = vmatprep.subr.bf16.mxu0 %v2549_v0 }
  0x73   :  { %691 = vmatmul.mubr.bf16.vlgmr.msra.gmra.mxu1 %v2284_v25  ;;  %v2347_v25 = vld [vmem:[#allocation12 + $0x20] sm:$0xff]  }
  0x74   :  { %424 = vmatmul.mubr.bf16.gmra.mxu0 %v2289_v31  ;;  %698 = vmatprep.mubr.bf16.mxu1 %v2287_v26 }
  0x75   :  { %431 = vmatprep.mubr.bf16.mxu0 %v2291_v32  ;;  %2084 = vmatpush3.bf16.msra.mxu0 %v2321_v42 }
  0x76   :  { %2085 = vmatprep.subr.bf16.mxu0 %v2549_v0  ;;  %2100 = vmatpush3.bf16.msra.mxu1 %v2315_v43 }
  0x77   :  { %2101 = vmatprep.subr.bf16.mxu1 %v2549_v0 }
  0x79   :  { %2086 = vmatpush3.bf16.msra.mxu0 %v2326_v44  ;;  %v2353_v44 = vld [vmem:[#allocation12 + $0x8] sm:$0xff]  }
  0x7a   :  { %2087 = vmatprep.subr.bf16.mxu0 %v2549_v0  ;;  %2102 = vmatpush3.bf16.msra.mxu1 %v2316_v47 }
  0x7b   :  { %2103 = vmatprep.subr.bf16.mxu1 %v2549_v0  ;;  %699 = vmatmul.mubr.bf16.gmra.mxu1 %v2289_v31  ;;  %v2349_v31 = vld [vmem:[#allocation12 + $0x18] sm:$0xff]  }
  0x7c   :  { %432 = vmatmul.mubr.bf16.gmra.mxu0 %v2294_v39  ;;  %706 = vmatprep.mubr.bf16.mxu1 %v2291_v32 }
  0x7d   :  { %439 = vmatprep.mubr.bf16.mxu0 %v2301_v40  ;;  %2088 = vmatpush3.bf16.msra.mxu0 %v2331_v48  ;;  %v2354_v48 = vld [vmem:[#allocation11] sm:$0xff]  }
  0x7e   :  { %2089 = vmatprep.subr.bf16.mxu0 %v2549_v0  ;;  %2104 = vmatpush3.bf16.msra.mxu1 %v2318_v49 }
  0x7f   :  { %2105 = vmatprep.subr.bf16.mxu1 %v2549_v0 }
  0x81   :  { %2090 = vmatpush3.bf16.msra.mxu0 %v2336_v50 }
  0x82   :  { %2091 = vmatprep.subr.bf16.mxu0 %v2549_v0  ;;  %2106 = vmatpush3.bf16.msra.mxu1 %v2320_v52 }
  0x83   :  { %2107 = vmatprep.subr.bf16.mxu1 %v2549_v0  ;;  %707 = vmatmul.mubr.bf16.gmra.mxu1 %v2294_v39 }
  0x84   :  { %440 = vmatmul.mubr.bf16.gmra.mxu0 %v2303_v45  ;;  %714 = vmatprep.mubr.bf16.mxu1 %v2301_v40 }
  0x85   :  { %447 = vmatprep.mubr.bf16.mxu0 %v2308_v46  ;;  %2092 = vmatpush3.bf16.msra.mxu0 %v2337_v62 }
  0x86   :  { %2108 = vmatpush3.bf16.msra.mxu1 %v2322_v54  ;;  %2093 = vmatprep.subr.bf16.mxu0 %v2549_v0  ;;  %v2355_v54 = vld [vmem:[#allocation12] sm:$0xff]  }
  0x87   :  { %2109 = vmatprep.subr.bf16.mxu1 %v2549_v0 }
  0x89   :  { %2094 = vmatpush3.bf16.msra.mxu0 %v2339_v1  ;;  %v2357_v1 = vld [vmem:[#allocation9 + $0x38] sm:$0xff]  }
  0x8a   :  { %2110 = vmatpush3.bf16.msra.mxu1 %v2327_v55  ;;  %2119 = vmatprep.subr.bf16.mxu0 %v2549_v0 }
  0x8b   :  { %2111 = vmatprep.subr.bf16.mxu1 %v2549_v0  ;;  %715 = vmatmul.mubr.bf16.gmra.mxu1 %v2303_v45 }
  0x8c   :  { %448 = vmatmul.mubr.bf16.gmra.mxu0 %v2310_v51  ;;  %722 = vmatprep.mubr.bf16.mxu1 %v2308_v46 }
  0x8d   :  { %455 = vmatprep.mubr.bf16.mxu0 %v2323_v53 }
  0x8e   :  { %2112 = vmatpush3.bf16.msra.mxu1 %v2332_v58 }
  0x8f   :  { %2113 = vmatprep.subr.bf16.mxu1 %v2549_v0 }
  0x92   :  { %2114 = vmatpush3.bf16.msra.mxu1 %v2338_v63 }
  0x93   :  { %723 = vmatmul.mubr.bf16.gmra.mxu1 %v2310_v51  ;;  %2139 = vmatprep.subr.bf16.mxu1 %v2549_v0 }
  0x94   :  { %456 = vmatmul.mubr.bf16.gmra.mxu0 %v2325_v56  ;;  %730 = vmatprep.mubr.bf16.mxu1 %v2323_v53 }
  0x95   :  { %463 = vmatprep.mubr.bf16.mxu0 %v2328_v57 }
  0x9b   :  { %731 = vmatmul.mubr.bf16.gmra.mxu1 %v2325_v56 }
  0x9c   :  { %464 = vmatmul.mubr.bf16.gmra.mxu0 %v2330_v59  ;;  %738 = vmatprep.mubr.bf16.mxu1 %v2328_v57 }
  0x9d   :  { %471 = vmatprep.mubr.bf16.mxu0 %v2333_v60 }
  0xa3   :  { %739 = vmatmul.mubr.bf16.gmra.mxu1 %v2330_v59 }
  0xa4   :  { %472 = vmatmul.mubr.bf16.gmra.mxu0 %v2335_v61  ;;  %746 = vmatprep.mubr.bf16.mxu1 %v2333_v60  ;;  %v2356_v60 = vld [vmem:[#allocation8 + $0x38] sm:$0xff]  }
  0xa5   :  { %2095 = vmatprep.mubr.msk.bf16.mxu0 %vm2550_vm0, %v2549_v0 }
  0xab   :  { %747 = vmatmul.mubr.bf16.gmra.mxu1 %v2335_v61 }
  0xac   :  { %2115 = vmatprep.mubr.msk.bf16.mxu1 %vm2550_vm0, %v2549_v0 }
 0x12c   :  { %v1891_v2 = vpop.f32.mrf.mxu0 }
 0x12e   :  { %v1892_v3 = vpop.f32.mrf.mxu0 }
 0x12f   :  { %v1893_v6 = vadd.f32 %v1892_v3, %v1891_v2 }
 0x130   :  { %v1894_v4 = vpop.f32.mrf.mxu0 }
 0x132   :  { %v1895_v5 = vpop.f32.mrf.mxu0 }
 0x133   :  { %v1896_v7 = vadd.f32 %v1895_v5, %v1894_v4  ;;  %v2673_v24 = vpop.f32.mrf.mxu1 }
 0x134   :  { %v2659_v9 = vpop.f32.mrf.mxu0 }
 0x135   :  { %v832_v10 = vpack.c.bf16 %v1896_v7, %v1893_v6  ;;  %v2676_v27 = vpop.f32.mrf.mxu1  ;;  %v2358_v6 = vld [vmem:[#allocation8 + $0x30] sm:$0xff]  }
 0x136   :  { %v2661_v12 = vpop.f32.mrf.mxu0 }
 0x137   :  { %v959_v13 = vrot.slane %v832_v10, 4  ;;  %2096 = vmatmul.mubr.bf16.vlgmr.msra.gmra.mxu0 %v832_v10  ;;  %v2681_v30 = vpop.f32.mrf.mxu1  ;;  %v1899_v51 = vadd.f32 %v2661_v12, %v2659_v9  ;;  %v2359_v12 = vld [vmem:[#allocation9 + $0x30] sm:$0xff]  }
 0x138   :  { %2120 = vmatpush3.bf16.msra.mxu0 %v2340_v8  ;;  %v2663_v15 = vpop.f32.mrf.mxu0  ;;  %2135 = vmatprep.mubr.msk.bf16.mxu0 %vm2550_vm0, %v2549_v0 }
 0x139   :  { %2116 = vmatmul.mubr.bf16.vlgmr.msra.gmra.mxu1 %v959_v13  ;;  %2121 = vmatprep.subr.bf16.mxu0 %v2549_v0  ;;  %v2684_v33 = vpop.f32.mrf.mxu1 }
 0x13a   :  { %2140 = vmatpush3.bf16.msra.mxu1 %v2341_v11  ;;  %v1901_v17 = vpop.f32.mrf.mxu0  ;;  %2155 = vmatprep.mubr.msk.bf16.mxu1 %vm2550_vm0, %v2549_v0 }
 0x13b   :  { %2141 = vmatprep.subr.bf16.mxu1 %v2549_v0  ;;  %v1961_v36 = vpop.f32.mrf.mxu1  ;;  %v1902_v52 = vadd.f32 %v1901_v17, %v2663_v15 }
 0x13c   :  { %2122 = vmatpush3.bf16.msra.mxu0 %v2342_v14  ;;  %v1903_v19 = vpop.f32.mrf.mxu0 }
 0x13d   :  { %2123 = vmatprep.subr.bf16.mxu0 %v2549_v0  ;;  %v1962_v39 = vpop.f32.mrf.mxu1  ;;  %v833_v63 = vpack.c.bf16 %v1902_v52, %v1899_v51  ;;  %v2367_v52 = vld [vmem:[#allocation9 + $0x10] sm:$0xff]  }
 0x13e   :  { %2142 = vmatpush3.bf16.msra.mxu1 %v2343_v16  ;;  %v1904_v21 = vpop.f32.mrf.mxu0  ;;  %v2689_v40 = vadd.f32 %v1962_v39, %v1961_v36  ;;  %v2360_v16 = vld [vmem:[#allocation8 + $0x28] sm:$0xff]  }
 0x13f   :  { %2143 = vmatprep.subr.bf16.mxu1 %v2549_v0  ;;  %v1964_v43 = vpop.f32.mrf.mxu1  ;;  %v1905_v57 = vadd.f32 %v1904_v21, %v1903_v19  ;;  %v2361_v21 = vld [vmem:[#allocation9 + $0x28] sm:$0xff]  }
 0x140   :  { %2124 = vmatpush3.bf16.msra.mxu0 %v2344_v18  ;;  %v1906_v23 = vpop.f32.mrf.mxu0 }
 0x141   :  { %2125 = vmatprep.subr.bf16.mxu0 %v2549_v0  ;;  %v1965_v46 = vpop.f32.mrf.mxu1 }
 0x142   :  { %2144 = vmatpush3.bf16.msra.mxu1 %v2345_v20  ;;  %v1907_v26 = vpop.f32.mrf.mxu0  ;;  %v2697_v47 = vadd.f32 %v1965_v46, %v1964_v43  ;;  %v2725_v20 = vld [vmem:[#allocation14 + $0x48] sm:$0xff]  ;;  %v2365_v43 = vld [vmem:[#allocation9 + $0x18] sm:$0xff]  }
 0x143   :  { %2145 = vmatprep.subr.bf16.mxu1 %v2549_v0  ;;  %v1967_v50 = vpop.f32.mrf.mxu1  ;;  %v1908_v58 = vadd.f32 %v1907_v26, %v1906_v23 }
 0x144   :  { %2126 = vmatpush3.bf16.msra.mxu0 %v2346_v22  ;;  %v2679_v29 = vpop.f32.mrf.mxu0  ;;  %v1293_v53 = vpack.c.bf16 %v2697_v47, %v2689_v40 }
 0x145   :  { %2127 = vmatprep.subr.bf16.mxu0 %v2549_v0  ;;  %v1968_v56 = vpop.f32.mrf.mxu1  ;;  %v834_v4 = vpack.c.bf16 %v1908_v58, %v1905_v57  ;;  %v2369_v58 = vld [vmem:[#allocation9 + $0x8] sm:$0xff]  }
 0x146   :  { %2146 = vmatpush3.bf16.msra.mxu1 %v2347_v25  ;;  %v1910_v32 = vpop.f32.mrf.mxu0  ;;  %v2708_v59 = vadd.f32 %v1968_v56, %v1967_v50  ;;  %v2368_v56 = vld [vmem:[#allocation8 + $0x8] sm:$0xff]  }
 0x147   :  { %2147 = vmatprep.subr.bf16.mxu1 %v2549_v0  ;;  %v1970_v61 = vpop.f32.mrf.mxu1  ;;  %v1911_v9 = vadd.f32 %v1910_v32, %v2679_v29 }
 0x148   :  { %2128 = vmatpush3.bf16.msra.mxu0 %v2348_v28  ;;  %v1912_v35 = vpop.f32.mrf.mxu0 }
 0x149   :  { %2129 = vmatprep.subr.bf16.mxu0 %v2549_v0  ;;  %v1971_v2 = vpop.f32.mrf.mxu1 }
 0x14a   :  { %2148 = vmatpush3.bf16.msra.mxu1 %v2349_v31  ;;  %v1913_v38 = vpop.f32.mrf.mxu0  ;;  %v2712_v5 = vadd.f32 %v1971_v2, %v1970_v61  ;;  %v1957_v61 = vadd.f32 %v2676_v27, %v2673_v24  ;;  %v2371_v2 = vld [vmem:[#allocation9] sm:$0xff]   ;;  %v2373_v24 = vld [vmem:[#allocation12 + $0x38] sm:$0xff]  }
 0x14b   :  { %2149 = vmatprep.subr.bf16.mxu1 %v2549_v0  ;;  %v1973_v7 = vpop.f32.mrf.mxu1  ;;  %v1914_v10 = vadd.f32 %v1913_v38, %v1912_v35  ;;  %v2364_v38 = vld [vmem:[#allocation8 + $0x18] sm:$0xff]  }
 0x14c   :  { %2130 = vmatpush3.bf16.msra.mxu0 %v2350_v34  ;;  %v2691_v42 = vpop.f32.mrf.mxu0  ;;  %v1294_v11 = vpack.c.bf16 %v2712_v5, %v2708_v59  ;;  %v2363_v34 = vld [vmem:[#allocation9 + $0x20] sm:$0xff]  }
 0x14d   :  { %2131 = vmatprep.subr.bf16.mxu0 %v2549_v0  ;;  %v1974_v13 = vpop.f32.mrf.mxu1  ;;  %v835_v19 = vpack.c.bf16 %v1914_v10, %v1911_v9  ;;  %v2375_v9 = vld [vmem:[#allocation12 + $0x30] sm:$0xff]  }
 0x14e   :  { %2150 = vmatpush3.bf16.msra.mxu1 %v2351_v37  ;;  %v2694_v45 = vpop.f32.mrf.mxu0  ;;  %v2723_v15 = vadd.f32 %v1974_v13, %v1973_v7 }
 0x14f   :  { %2151 = vmatprep.subr.bf16.mxu1 %v2549_v0  ;;  %v1976_v17 = vpop.f32.mrf.mxu1  ;;  %v1917_v29 = vadd.f32 %v2694_v45, %v2691_v42 }
 0x150   :  { %2132 = vmatpush3.bf16.msra.mxu0 %v2352_v41  ;;  %v2699_v49 = vpop.f32.mrf.mxu0 }
 0x151   :  { %2133 = vmatprep.subr.bf16.mxu0 %v2549_v0  ;;  %v1977_v22 = vpop.f32.mrf.mxu1 }
 0x152   :  { %2152 = vmatpush3.bf16.msra.mxu1 %v2353_v44  ;;  %v1919_v55 = vpop.f32.mrf.mxu0  ;;  %v2729_v25 = vadd.f32 %v1977_v22, %v1976_v17  ;;  %v2378_v17 = vld [vmem:[#allocation11 + $0x20] sm:$0xff]   ;;  %v2382_v22 = vld [vmem:[#allocation11 + $0x10] sm:$0xff]  }
 0x153   :  { %2153 = vmatprep.subr.bf16.mxu1 %v2549_v0  ;;  %v1979_v26 = vpop.f32.mrf.mxu1  ;;  %v1920_v31 = vadd.f32 %v1919_v55, %v2699_v49 }
 0x154   :  { %2134 = vmatpush3.bf16.msra.mxu0 %v2354_v48  ;;  %v1921_v62 = vpop.f32.mrf.mxu0  ;;  %v1295_v32 = vpack.c.bf16 %v2729_v25, %v2723_v15  ;;  %v2366_v48 = vld [vmem:[#allocation8 + $0x10] sm:$0xff]  }
 0x155   :  { %2167 = vmatprep.subr.bf16.mxu0 %v2549_v0  ;;  %v1980_v35 = vpop.f32.mrf.mxu1  ;;  %v836_v42 = vpack.c.bf16 %v1920_v31, %v1917_v29  ;;  %v1960_v62 = vadd.f32 %v2684_v33, %v2681_v30  ;;  %v2374_v33 = vld [vmem:[#allocation11 + $0x30] sm:$0xff]   ;;  %v2387_v29 = vld [vmem:[#allocation12] sm:$0xff]  }
 0x156   :  { %2154 = vmatpush3.bf16.msra.mxu1 %v2355_v54  ;;  %v1922_v3 = vpop.f32.mrf.mxu0  ;;  %v2740_v37 = vadd.f32 %v1980_v35, %v1979_v26  ;;  %v2385_v26 = vld [vmem:[#allocation12 + $0x8] sm:$0xff]  }
 0x157   :  { %2136 = vmatmul.mubr.bf16.vlgmr.msra.gmra.mxu0 %v833_v63  ;;  %2187 = vmatprep.subr.bf16.mxu1 %v2549_v0  ;;  %v1982_v39 = vpop.f32.mrf.mxu1  ;;  %v2370_v63 = vld [vmem:[#allocation8] sm:$0xff]  }
 0x158   :  { %2168 = vmatpush3.bf16.msra.mxu0 %v2356_v60  ;;  %2183 = vmatprep.mubr.msk.bf16.mxu0 %vm2550_vm0, %v2549_v0  ;;  %v1924_v8 = vpop.f32.mrf.mxu0 }
 0x159   :  { %2156 = vmatmul.mubr.bf16.vlgmr.msra.gmra.mxu1 %v834_v4  ;;  %2169 = vmatprep.subr.bf16.mxu0 %v2549_v0  ;;  %v1983_v44 = vpop.f32.mrf.mxu1  ;;  %v1292_v4 = vpack.c.bf16 %v1960_v62, %v1957_v61 }
 0x15a   :  { %2188 = vmatpush3.bf16.msra.mxu1 %v2357_v1  ;;  %2159 = vmatprep.mubr.msk.bf16.mxu1 %vm2550_vm0, %v2549_v0  ;;  %v1925_v14 = vpop.f32.mrf.mxu0  ;;  %v2744_v46 = vadd.f32 %v1983_v44, %v1982_v39 }
 0x15b   :  { %2189 = vmatprep.subr.bf16.mxu1 %v2549_v0  ;;  %v2362_v0 = vld [vmem:[#allocation8 + $0x20] sm:$0xff]   ;;  %v1985_v49 = vpop.f32.mrf.mxu1  ;;  %v1420_v30 = vrot.slane %v1292_v4, 4  ;;  %v2377_v14 = vld [vmem:[#allocation12 + $0x28] sm:$0xff]  }
 0x15c   :  { %2170 = vmatpush3.bf16.msra.mxu0 %v2358_v6  ;;  %v1927_v18 = vpop.f32.mrf.mxu0  ;;  %v1296_v51 = vpack.c.bf16 %v2744_v46, %v2740_v37  ;;  %v2372_v6 = vld [vmem:[#allocation11 + $0x38] sm:$0xff]  }
 0x15d   :  { %2171 = vmatprep.subr.bf16.mxu0 %v2725_v20  ;;  %v1986_v54 = vpop.f32.mrf.mxu1  ;;  %v2379_v18 = vld [vmem:[#allocation12 + $0x20] sm:$0xff]  }
 0x15e   :  { %2190 = vmatpush3.bf16.msra.mxu1 %v2359_v12  ;;  %v1928_v23 = vpop.f32.mrf.mxu0  ;;  %v2376_v12 = vld [vmem:[#allocation11 + $0x28] sm:$0xff]  }
 0x15f   :  { %2191 = vmatprep.subr.bf16.mxu1 %v2725_v20  ;;  %v1988_v57 = vpop.f32.mrf.mxu1  ;;  %v2383_v23 = vld [vmem:[#allocation12 + $0x10] sm:$0xff]  }
 0x160   :  { %2172 = vmatpush3.bf16.msra.mxu0 %v2360_v16  ;;  %v1930_v28 = vpop.f32.mrf.mxu0 }
 0x161   :  { %2160 = vmatmul.mubr.bf16.gmra.mxu1 %v835_v19  ;;  %2173 = vmatprep.subr.bf16.mxu0 %v2725_v20  ;;  %v1989_v60 = vpop.f32.mrf.mxu1  ;;  %v2380_v19 = vld [vmem:[#allocation11 + $0x18] sm:$0xff]   ;;  %v2386_v28 = vld [vmem:[#allocation11] sm:$0xff]  }
 0x162   :  { %2192 = vmatpush3.bf16.msra.mxu1 %v2361_v21  ;;  %2163 = vmatprep.mubr.msk.bf16.mxu1 %vm2550_vm0, %v2725_v20  ;;  %v1931_v36 = vpop.f32.mrf.mxu0  ;;  %v2381_v21 = vld [vmem:[#allocation12 + $0x18] sm:$0xff]  }
 0x163   :  { %2193 = vmatprep.subr.bf16.mxu1 %v2725_v20  ;;  %v1991_v1 = vpop.f32.mrf.mxu1 }
 0x164   :  { %2174 = vmatpush3.bf16.msra.mxu0 %v2362_v0  ;;  %v1933_v41 = vpop.f32.mrf.mxu0  ;;  %v2384_v0 = vld [vmem:[#allocation11 + $0x8] sm:$0xff]  }
 0x165   :  { %2175 = vmatprep.subr.bf16.mxu0 %v2725_v20  ;;  %v1992_v3 = vpop.f32.mrf.mxu1 }
 0x166   :  { %2194 = vmatpush3.bf16.msra.mxu1 %v2363_v34  ;;  %v1934_v45 = vpop.f32.mrf.mxu0 }
 0x167   :  { %2195 = vmatprep.subr.bf16.mxu1 %v2725_v20  ;;  %v1994_v7 = vpop.f32.mrf.mxu1 }
 0x168   :  { %2176 = vmatpush3.bf16.msra.mxu0 %v2364_v38  ;;  %v1936_v50 = vpop.f32.mrf.mxu0 }
 0x169   :  { %2164 = vmatmul.mubr.bf16.gmra.mxu1 %v836_v42  ;;  %2177 = vmatprep.subr.bf16.mxu0 %v2725_v20  ;;  %v1995_v27 = vpop.f32.mrf.mxu1 }
 0x16a   :  { %2196 = vmatpush3.bf16.msra.mxu1 %v2365_v43  ;;  %2203 = vmatprep.mubr.msk.bf16.mxu1 %vm2550_vm0, %v2725_v20  ;;  %v1937_v55 = vpop.f32.mrf.mxu0 }
 0x16b   :  { %2197 = vmatprep.subr.bf16.mxu1 %v2725_v20  ;;  %v1997_v8 = vpop.f32.mrf.mxu1 }
 0x16c   :  { %2178 = vmatpush3.bf16.msra.mxu0 %v2366_v48 }
 0x16d   :  { %2179 = vmatprep.subr.bf16.mxu0 %v2725_v20  ;;  %v1998_v10 = vpop.f32.mrf.mxu1 }
 0x16e   :  { %2198 = vmatpush3.bf16.msra.mxu1 %v2367_v52 }
 0x16f   :  { %2199 = vmatprep.subr.bf16.mxu1 %v2725_v20  ;;  %v2000_v13 = vpop.f32.mrf.mxu1 }
 0x170   :  { %2180 = vmatpush3.bf16.msra.mxu0 %v2368_v56 }
 0x171   :  { %2181 = vmatprep.subr.bf16.mxu0 %v2725_v20  ;;  %v2001_v16 = vpop.f32.mrf.mxu1 }
 0x172   :  { %2200 = vmatpush3.bf16.msra.mxu1 %v2369_v58 }
 0x173   :  { %2201 = vmatprep.subr.bf16.mxu1 %v2725_v20 }
 0x174   :  { %2182 = vmatpush3.bf16.msra.mxu0 %v2370_v63 }
 0x175   :  { %2207 = vmatprep.subr.bf16.mxu0 %v2725_v20 }
 0x176   :  { %2202 = vmatpush3.bf16.msra.mxu1 %v2371_v2 }
 0x177   :  { %2184 = vmatmul.mubr.bf16.vlgmr.msra.gmra.mxu0 %v1292_v4  ;;  %2227 = vmatprep.subr.bf16.mxu1 %v2725_v20 }
 0x178   :  { %2208 = vmatpush3.bf16.msra.mxu0 %v2372_v6  ;;  %2223 = vmatprep.mubr.msk.bf16.mxu0 %vm2550_vm0, %v2725_v20 }
 0x179   :  { %2204 = vmatmul.mubr.bf16.vlgmr.msra.gmra.mxu1 %v1420_v30  ;;  %2209 = vmatprep.subr.bf16.mxu0 %v2725_v20 }
 0x17a   :  { %2228 = vmatpush3.bf16.msra.mxu1 %v2373_v24  ;;  %2243 = vmatprep.mubr.msk.bf16.mxu1 %vm2550_vm0, %v2725_v20 }
 0x17b   :  { %2229 = vmatprep.subr.bf16.mxu1 %v2725_v20 }
 0x17c   :  { %2210 = vmatpush3.bf16.msra.mxu0 %v2374_v33 }
 0x17d   :  { %2211 = vmatprep.subr.bf16.mxu0 %v2725_v20 }
 0x17e   :  { %2230 = vmatpush3.bf16.msra.mxu1 %v2375_v9 }
 0x17f   :  { %2231 = vmatprep.subr.bf16.mxu1 %v2725_v20 }
 0x180   :  { %2212 = vmatpush3.bf16.msra.mxu0 %v2376_v12 }
 0x181   :  { %2213 = vmatprep.subr.bf16.mxu0 %v2725_v20 }
 0x182   :  { %2232 = vmatpush3.bf16.msra.mxu1 %v2377_v14 }
 0x183   :  { %2233 = vmatprep.subr.bf16.mxu1 %v2725_v20 }
 0x184   :  { %2214 = vmatpush3.bf16.msra.mxu0 %v2378_v17 }
 0x185   :  { %2215 = vmatprep.subr.bf16.mxu0 %v2725_v20 }
 0x186   :  { %2234 = vmatpush3.bf16.msra.mxu1 %v2379_v18 }
 0x187   :  { %2235 = vmatprep.subr.bf16.mxu1 %v2725_v20 }
 0x188   :  { %2216 = vmatpush3.bf16.msra.mxu0 %v2380_v19 }
 0x189   :  { %2217 = vmatprep.subr.bf16.mxu0 %v2725_v20 }
 0x18a   :  { %2236 = vmatpush3.bf16.msra.mxu1 %v2381_v21 }
 0x18b   :  { %2237 = vmatprep.subr.bf16.mxu1 %v2725_v20 }
 0x18c   :  { %2218 = vmatpush3.bf16.msra.mxu0 %v2382_v22 }
 0x18d   :  { %2219 = vmatprep.subr.bf16.mxu0 %v2725_v20 }
 0x18e   :  { %2238 = vmatpush3.bf16.msra.mxu1 %v2383_v23 }
 0x18f   :  { %2239 = vmatprep.subr.bf16.mxu1 %v2725_v20 }
 0x190   :  { %2220 = vmatpush3.bf16.msra.mxu0 %v2384_v0 }
 0x191   :  { %2221 = vmatprep.subr.bf16.mxu0 %v2725_v20 }
 0x192   :  { %2240 = vmatpush3.bf16.msra.mxu1 %v2385_v26 }
 0x193   :  { %2241 = vmatprep.subr.bf16.mxu1 %v2725_v20 }
 0x194   :  { %2222 = vmatpush3.bf16.msra.mxu0 %v2386_v28 }
 0x196   :  { %2242 = vmatpush3.bf16.msra.mxu1 %v2387_v29 }
 0x197   :  { %2224 = vmatmul.mubr.bf16.vlgmr.msra.gmra.mxu0 %v1293_v53 }
 0x199   :  { %2244 = vmatmul.mubr.bf16.vlgmr.msra.gmra.mxu1 %v1294_v11 }
 0x19a   :  { %2247 = vmatprep.mubr.msk.bf16.mxu1 %vm2550_vm0, %v2725_v20 }
 0x1a1   :  { %2248 = vmatmul.mubr.bf16.gmra.mxu1 %v1295_v32 }
 0x1a2   :  { %2251 = vmatprep.mubr.msk.bf16.mxu1 %vm2550_vm0, %v2725_v20 }
 0x1a9   :  { %2252 = vmatmul.mubr.bf16.gmra.mxu1 %v1296_v51 }
 0x1f7   :  { %v935_v40 = vpop.f32.mrf.mxu0 }
 0x1f8   :  { %941 = vst [vmem:[#allocation14] sm:$0xff] %v935_v40 }
 0x1f9   :  { %v2097_v47 = vpop.f32.mrf.mxu0  ;;  %v1043_v53 = vpop.f32.mrf.mxu1 }
 0x1fa   :  { %1049 = vst [vmem:[#allocation14 + $0x8] sm:$0xff] %v1043_v53 }
 0x1fb   :  { %v938_v59 = vpop.f32.mrf.mxu0  ;;  %v2117_v5 = vpop.f32.mrf.mxu1 }
 0x1fd   :  { %v2098_v11 = vpop.f32.mrf.mxu0  ;;  %v1046_v31 = vpop.f32.mrf.mxu1 }
 0x1ff   :  { %v2118_v34 = vpop.f32.mrf.mxu1 }
 0x217   :  { %v1148_v35 = vpop.f32.mrf.mxu0 }
 0x218   :  { %1155 = vst [vmem:[#allocation14 + $0x10] sm:$0xff] %v1148_v35 }
 0x219   :  { %v2137_v15 = vpop.f32.mrf.mxu0  ;;  %v1255_v25 = vpop.f32.mrf.mxu1 }
 0x21a   :  { %1277 = vst [vmem:[#allocation14 + $0x20] sm:$0xff] %v1255_v25 }
 0x21b   :  { %v1151_v20 = vpop.f32.mrf.mxu0  ;;  %v2157_v32 = vpop.f32.mrf.mxu1 }
 0x21c   :  { %1156 = vst [vmem:[#allocation14 + $0x18] sm:$0xff] %v1151_v20 }
 0x21d   :  { %v2138_v36 = vpop.f32.mrf.mxu0  ;;  %v1258_v37 = vpop.f32.mrf.mxu1 }
 0x21e   :  { %1278 = vst [vmem:[#allocation14 + $0x28] sm:$0xff] %v1258_v37 }
 0x21f   :  { %v2158_v38 = vpop.f32.mrf.mxu1 }
 0x221   :  { %v1263_v39 = vpop.f32.mrf.mxu1 }
 0x222   :  { %1279 = vst [vmem:[#allocation14 + $0x30] sm:$0xff] %v1263_v39 }
 0x223   :  { %v2161_v41 = vpop.f32.mrf.mxu1 }
 0x225   :  { %v1266_v42 = vpop.f32.mrf.mxu1 }
 0x226   :  { %1280 = vst [vmem:[#allocation14 + $0x38] sm:$0xff] %v1266_v42 }
 0x227   :  { %v2162_v43 = vpop.f32.mrf.mxu1 }
 0x229   :  { %v1271_v44 = vpop.f32.mrf.mxu1 }
 0x22a   :  { %1281 = vst [vmem:[#allocation14 + $0x40] sm:$0xff] %v1271_v44 }
 0x22b   :  { %v2165_v45 = vpop.f32.mrf.mxu1 }
 0x22d   :  { %v1274_v46 = vpop.f32.mrf.mxu1 }
 0x22f   :  { %v2166_v48 = vpop.f32.mrf.mxu1 }
 0x237   :  { %v1395_v49 = vpop.f32.mrf.mxu0 }
 0x238   :  { %1402 = vst [vmem:[#allocation14 + $0x80] sm:$0xff] %v1395_v49 }
 0x239   :  { %v2185_v50 = vpop.f32.mrf.mxu0  ;;  %v1504_v51 = vpop.f32.mrf.mxu1 }
 0x23a   :  { %1510 = vst [vmem:[#allocation14 + $0x88] sm:$0xff] %v1504_v51 }
 0x23b   :  { %v1398_v52 = vpop.f32.mrf.mxu0  ;;  %v2205_v54 = vpop.f32.mrf.mxu1 }
 0x23d   :  { %v2186_v55 = vpop.f32.mrf.mxu0  ;;  %v1507_v56 = vpop.f32.mrf.mxu1 }
 0x23f   :  { %v2206_v57 = vpop.f32.mrf.mxu1 }
 0x257   :  { %v1609_v58 = vpop.f32.mrf.mxu0 }
 0x258   :  { %1616 = vst [vmem:[#allocation14 + $0x90] sm:$0xff] %v1609_v58 }
 0x259   :  { %v2225_v60 = vpop.f32.mrf.mxu0  ;;  %v1716_v61 = vpop.f32.mrf.mxu1 }
 0x25a   :  { %1738 = vst [vmem:[#allocation14 + $0xa0] sm:$0xff] %v1716_v61 }
 0x25b   :  { %v1612_v62 = vpop.f32.mrf.mxu0  ;;  %v2245_v63 = vpop.f32.mrf.mxu1 }
 0x25c   :  { %1617 = vst [vmem:[#allocation14 + $0x98] sm:$0xff] %v1612_v62 }
 0x25d   :  { %v2226_v1 = vpop.f32.mrf.mxu0  ;;  %v1719_v2 = vpop.f32.mrf.mxu1 }
 0x25e   :  { %1739 = vst [vmem:[#allocation14 + $0xa8] sm:$0xff] %v1719_v2 }
 0x25f   :  { %v2246_v3 = vpop.f32.mrf.mxu1 }
 0x261   :  { %v1724_v4 = vpop.f32.mrf.mxu1 }
 0x262   :  { %1740 = vst [vmem:[#allocation14 + $0xb0] sm:$0xff] %v1724_v4 }
 0x263   :  { %v2249_v6 = vpop.f32.mrf.mxu1 }
 0x265   :  { %v1727_v7 = vpop.f32.mrf.mxu1 }
 0x266   :  { %1741 = vst [vmem:[#allocation14 + $0xb8] sm:$0xff] %v1727_v7 }
 0x267   :  { %v2250_v24 = vpop.f32.mrf.mxu1 }
 0x269   :  { %v1732_v27 = vpop.f32.mrf.mxu1 }
 0x26a   :  { %1742 = vst [vmem:[#allocation14 + $0xc0] sm:$0xff] %v1732_v27 }
 0x26b   :  { %v2253_v30 = vpop.f32.mrf.mxu1 }
 0x26c   :  { %2520 = shalt.err (!%p2517_p6)
}
 0x26d   :  { %1754 = dma.vmem_to_hbm [thread:$0]  %s1749_s5, 4096, %s2808_s6, [#allocation5], %s2540_s24, %s2540_s24, %s2541_s25   ;;  %v1735_v33 = vpop.f32.mrf.mxu1 }
 0x26f   :  { %v2254_v8 = vpop.f32.mrf.mxu1 }
 0x270   :  { %2537 = dma.done.wait [#allocation5], 4096  }
 0x271   :  { %2538 = vsyncadd [#allocation5], 4294963200 }
 0x272   :  { %1758 = vsyncpa [#allocation4], 1 }
 0x273   :  { %1759 = vsyncpa [#allocation7], 1 }
 0x274   :  { %1760 = vsyncpa [#allocation10], 1 }
 0x275   :  { %1761 = vsyncpa [#allocation13], 1 }
 0x276   :  { %1762 = vsyncpa [#allocation5], 1 }

</bundles_post_ra>
